<compile_context>
chip_gen: v6e
topology: v6e:2x2x1
jax: 0.10.0
libtpu: 0.0.40
codegen_flags: <defaults>
</compile_context>

<pallas_src>
import functools

import jax
import jax.numpy as jnp
import numpy as np
from jax.experimental import pallas as pl
from jax.experimental.pallas import tpu as pltpu


def _round_up(x, m):
    return (x + m - 1) // m * m


def _pick_tile_h(H_out, W_out, C_pad, tile_budget_bytes=2 * 1024 * 1024):
    """Pick an output-row tile height TH (divisor of H_out): big enough to
    amortize per-grid-step overhead (>=512 flattened rows when possible) but
    small enough that the f32 output tile fits a conservative VMEM budget."""
    divs = [d for d in range(1, H_out + 1) if H_out % d == 0]
    best = divs[0]
    for d in divs:
        if d * W_out * C_pad * 4 <= tile_budget_bytes:
            best = d
            if d * W_out >= 512:
                break
    return best


# --------------------------- pass 1: conv + stats ---------------------------
def _conv_stats_kernel(x_ref, w_ref, y_ref, stat_ref, *,
                       TH, W_out, KH, KW, C_in, C_out, C_pad, stride, groups):
    """x_ref:    (1, Hp, Wp, C_in)       padded NHWC input (bf16)
       w_ref:    (KH*KW*cin_g, C_pad)    packed conv weights (bf16)
       y_ref:    (1, TH, W_out, C_pad)   raw conv output tile (f32, lane-dense)
       stat_ref: (1, 1, 2, C_pad)        per-tile [sum, sum_sq] per channel"""
    t = pl.program_id(1)
    cin_g = C_in // groups
    cout_g = C_out // groups
    hw = TH * W_out
    row0 = pl.multiple_of(t * (TH * stride), TH * stride)

    def tap(kh, kw, g):
        if stride == 1:
            rs = pl.ds(row0 + kh, TH)
            cs = pl.ds(kw, W_out)
        else:
            rs = pl.ds(row0 + kh, TH, stride=stride)
            cs = pl.ds(kw, W_out, stride=stride)
        return x_ref[0, rs, cs, g * cin_g:(g + 1) * cin_g]      # (TH, W_out, cin_g)

    y_parts = []
    for g in range(groups):
        taps = [tap(kh, kw, g) for kh in range(KH) for kw in range(KW)]
        patch = taps[0] if len(taps) == 1 else jnp.concatenate(taps, axis=-1)
        patch = patch.reshape(hw, KH * KW * cin_g)              # im2col (bf16)
        c0 = g * cout_g
        c1 = C_pad if g == groups - 1 else (g + 1) * cout_g
        # One MXU matmul per (tile, group): contraction depth = KH*KW*cin_g,
        # accumulation handled by the MXU in f32 (no per-tap VPU adds).
        y_parts.append(jnp.dot(patch, w_ref[:, c0:c1],
                               preferred_element_type=jnp.float32))
    y = y_parts[0] if groups == 1 else jnp.concatenate(y_parts, axis=-1)  # (hw, C_pad)

    y_ref[0] = y.reshape(TH, W_out, C_pad)

    s1 = jnp.sum(y, axis=0, keepdims=True)                      # (1, C_pad)
    s2 = jnp.sum(y * y, axis=0, keepdims=True)
    stat_ref[0, 0] = jnp.concatenate([s1, s2], axis=0)          # (2, C_pad)


# ----------------------- pass 2: BN normalize + Swish -----------------------
def _bn_act_kernel(stat_ref, gamma_ref, beta_ref, y_ref, o_ref, *,
                   count, eps, use_act):
    """stat_ref: (N, HT, 2, C_pad) all partial sums (tiny, re-reduced per step
                 so the grid stays safely 'parallel' across cores)
       gamma/beta: (1, C_pad); y_ref/o_ref: (1, TH, W_out, C_pad)."""
    tot = jnp.sum(stat_ref[...], axis=(0, 1))                   # (2, C_pad)
    mean = tot[0:1, :] * (1.0 / count)                          # (1, C_pad)
    var = tot[1:2, :] * (1.0 / count) - mean * mean             # biased var
    scale = gamma_ref[...] * jax.lax.rsqrt(var + eps)
    shift = beta_ref[...] - mean * scale
    z = y_ref[...] * scale + shift
    if use_act:
        z = z * jax.nn.sigmoid(z)                               # Swish
    o_ref[...] = z.astype(o_ref.dtype)


# --------------------------------- wrapper ----------------------------------
@functools.partial(jax.jit, static_argnames=("stride", "groups", "eps", "use_act"))
def conv_bn_forward(x_nchw, weight_oihw, gamma, beta, *,
                    stride=1, groups=1, eps=1e-3, use_act=False):
    """JAX/Pallas equivalent of _conv_bn.forward (NCHW in / NCHW out)."""
    N, C_in, H, W = x_nchw.shape
    C_out, cin_g, KH, KW = weight_oihw.shape
    assert KH == KW, "module always builds square kernels (padding = k // 2)"
    assert cin_g == C_in // groups and C_out % groups == 0
    pad = KH // 2
    H_out = (H + 2 * pad - KH) // stride + 1
    W_out = (W + 2 * pad - KW) // stride + 1
    C_pad = _round_up(C_out, 128)                 # lane-dense compute & stores
    Hp, Wp = H + 2 * pad, W + 2 * pad

    # --- glue: layout conversion, zero padding, weight packing (plain JAX) ---
    # TODO(synk): for very large feature maps the input H axis should also be
    #             halo-tiled (manual DMA), which would additionally remove the
    #             padded HBM copy; per-image residency is fine for typical
    #             EfficientNet shapes and keeps the kernel robust.
    x_nhwc = jnp.transpose(x_nchw, (0, 2, 3, 1)).astype(jnp.bfloat16)
    x_pad = jnp.pad(x_nhwc, ((0, 0), (pad, pad), (pad, pad), (0, 0)))

    # (C_out, cin_g, KH, KW) -> (KH, KW, cin_g, C_out) -> (KH*KW*cin_g, C_pad)
    w_packed = jnp.transpose(weight_oihw, (2, 3, 1, 0)).reshape(KH * KW * cin_g, C_out)
    w_packed = jnp.pad(w_packed, ((0, 0), (0, C_pad - C_out))).astype(jnp.bfloat16)

    gamma_p = jnp.pad(gamma.astype(jnp.float32), (0, C_pad - C_out),
                      constant_values=1.0).reshape(1, C_pad)
    beta_p = jnp.pad(beta.astype(jnp.float32), (0, C_pad - C_out)).reshape(1, C_pad)

    TH = _pick_tile_h(H_out, W_out, C_pad)
    HT = H_out // TH
    cparams = pltpu.CompilerParams(
        dimension_semantics=("parallel", "parallel"),
        vmem_limit_bytes=48 * 1024 * 1024)        # above defaults, below v7x 64 MiB

    # Pass 1: fused conv + per-tile channel statistics.
    conv_raw, stats = pl.pallas_call(
        functools.partial(_conv_stats_kernel, TH=TH, W_out=W_out, KH=KH, KW=KW,
                          C_in=C_in, C_out=C_out, C_pad=C_pad,
                          stride=stride, groups=groups),
        grid=(N, HT),
        in_specs=[
            pl.BlockSpec((1, Hp, Wp, C_in), lambda n, t: (n, 0, 0, 0)),
            pl.BlockSpec((KH * KW * cin_g, C_pad), lambda n, t: (0, 0)),
        ],
        out_specs=[
            pl.BlockSpec((1, TH, W_out, C_pad), lambda n, t: (n, t, 0, 0)),
            pl.BlockSpec((1, 1, 2, C_pad), lambda n, t: (n, t, 0, 0)),
        ],
        out_shape=[
            jax.ShapeDtypeStruct((N, H_out, W_out, C_pad), jnp.float32),
            jax.ShapeDtypeStruct((N, HT, 2, C_pad), jnp.float32),
        ],
        compiler_params=cparams,
    )(x_pad, w_packed)

    # Pass 2: BN normalize (+ Swish), tile-by-tile, lane-dense.
    out_nhwc = pl.pallas_call(
        functools.partial(_bn_act_kernel, count=float(N * H_out * W_out),
                          eps=float(eps), use_act=bool(use_act)),
        grid=(N, HT),
        in_specs=[
            pl.BlockSpec((N, HT, 2, C_pad), lambda n, t: (0, 0, 0, 0)),
            pl.BlockSpec((1, C_pad), lambda n, t: (0, 0)),
            pl.BlockSpec((1, C_pad), lambda n, t: (0, 0)),
            pl.BlockSpec((1, TH, W_out, C_pad), lambda n, t: (n, t, 0, 0)),
        ],
        out_specs=pl.BlockSpec((1, TH, W_out, C_pad), lambda n, t: (n, t, 0, 0)),
        out_shape=jax.ShapeDtypeStruct((N, H_out, W_out, C_pad), jnp.float32),
        compiler_params=cparams,
    )(stats, gamma_p, beta_p, conv_raw)

    return jnp.transpose(out_nhwc[..., :C_out], (0, 3, 1, 2))   # back to NCHW


def _reference(x_nchw, weight_oihw, gamma, beta, *, stride, groups, eps, use_act):
    """Pure-JAX reference (XLA conv) for a sanity check."""
    KH = weight_oihw.shape[2]
    pad = KH // 2
    y = jax.lax.conv_general_dilated(
        x_nchw, weight_oihw, window_strides=(stride, stride),
        padding=[(pad, pad), (pad, pad)],
        dimension_numbers=("NCHW", "OIHW", "NCHW"),
        feature_group_count=groups)
    mean = jnp.mean(y, axis=(0, 2, 3), keepdims=True)
    var = jnp.var(y, axis=(0, 2, 3), keepdims=True)   # biased, matches torch BN
    z = (y - mean) * jax.lax.rsqrt(var + eps)
    z = z * gamma.reshape(1, -1, 1, 1) + beta.reshape(1, -1, 1, 1)
    if use_act:
        z = z * jax.nn.sigmoid(z)
    return z


if __name__ == "__main__":
    # _conv_bn(inplanes=4, outplanes=8, kernel_size=3, stride=1, group=1, use_act=True)
    inplanes, outplanes, ksize, stride, group, use_act = 4, 8, 3, 1, 1, True
    eps = 1e-3

    key = jax.random.PRNGKey(0)
    kx, kw, kg, kb = jax.random.split(key, 4)

    x = jax.random.normal(kx, (2, inplanes, 16, 16), jnp.float32)
    fan_in = (inplanes // group) * ksize * ksize
    weight = jax.random.normal(
        kw, (outplanes, inplanes // group, ksize, ksize), jnp.float32) / jnp.sqrt(fan_in)
    gamma = 1.0 + 0.5 * jax.random.normal(kg, (outplanes,), jnp.float32)
    beta = 0.1 * jax.random.normal(kb, (outplanes,), jnp.float32)

    out = conv_bn_forward(x, weight, gamma, beta,
                          stride=stride, groups=group, eps=eps, use_act=use_act)
    out = jax.block_until_ready(out)

    ref = _reference(x, weight, gamma, beta,
                     stride=stride, groups=group, eps=eps, use_act=use_act)
    ref = jax.block_until_ready(ref)

    assert out.shape == (2, outplanes, 16, 16), out.shape
    assert np.allclose(np.asarray(out), np.asarray(ref), atol=5e-2, rtol=5e-2), \
        float(np.max(np.abs(np.asarray(out) - np.asarray(ref))))

    print("KERNEL_OK")
</pallas_src>

<mosaic_0001>
module attributes {stable_mosaic.version = 11 : i64} {
  func.func @_conv_stats_kernel(%arg0: i32, %arg1: i32, %arg2: memref<1x18x18x4xbf16, #tpu.memory_space<vmem>>, %arg3: memref<36x128xbf16, #tpu.memory_space<vmem>>, %arg4: memref<1x16x16x128xf32, #tpu.memory_space<vmem>>, %arg5: memref<1x1x2x128xf32, #tpu.memory_space<vmem>>) attributes {dimension_semantics = [#tpu.dimension_semantics<parallel>, #tpu.dimension_semantics<parallel>], iteration_bounds = array<i64: 2, 1>, scalar_prefetch = 0 : i64, scratch_operands = 0 : i64, tpu.core_type = #tpu.core_type<tc>, window_params = [{transform_indices = @transform_0, window_bounds = array<i64: 1, 18, 18, 4>}, {pipeline_mode = #tpu.pipeline_mode<synchronous>, transform_indices = @transform_1, window_bounds = array<i64: 36, 128>}, {transform_indices = @transform_2, window_bounds = array<i64: 1, 16, 16, 128>}, {transform_indices = @transform_3, window_bounds = array<i64: 1, 1, 2, 128>}]} {
    %c16_i32 = arith.constant 16 : i32
    %0 = arith.muli %arg1, %c16_i32 : i32
    %1 = tpu.assume_multiple %0, 16 : i32
    %c0_i32 = arith.constant 0 : i32
    %2 = arith.addi %1, %c0_i32 : i32
    %c0 = arith.constant 0 : index
    %3 = arith.index_cast %2 : i32 to index
    %c0_0 = arith.constant 0 : index
    %c0_1 = arith.constant 0 : index
    %4 = vector.load %arg2[%c0, %3, %c0_0, %c0_1] : memref<1x18x18x4xbf16, #tpu.memory_space<vmem>>, vector<1x16x16x4xbf16>
    %5 = vector.shape_cast %4 : vector<1x16x16x4xbf16> to vector<16x16x4xbf16>
    %c0_i32_2 = arith.constant 0 : i32
    %6 = arith.addi %1, %c0_i32_2 : i32
    %c0_3 = arith.constant 0 : index
    %7 = arith.index_cast %6 : i32 to index
    %c1 = arith.constant 1 : index
    %c0_4 = arith.constant 0 : index
    %8 = vector.load %arg2[%c0_3, %7, %c1, %c0_4] : memref<1x18x18x4xbf16, #tpu.memory_space<vmem>>, vector<1x16x16x4xbf16>
    %9 = vector.shape_cast %8 : vector<1x16x16x4xbf16> to vector<16x16x4xbf16>
    %c0_i32_5 = arith.constant 0 : i32
    %10 = arith.addi %1, %c0_i32_5 : i32
    %c0_6 = arith.constant 0 : index
    %11 = arith.index_cast %10 : i32 to index
    %c2 = arith.constant 2 : index
    %c0_7 = arith.constant 0 : index
    %12 = vector.load %arg2[%c0_6, %11, %c2, %c0_7] : memref<1x18x18x4xbf16, #tpu.memory_space<vmem>>, vector<1x16x16x4xbf16>
    %13 = vector.shape_cast %12 : vector<1x16x16x4xbf16> to vector<16x16x4xbf16>
    %c1_i32 = arith.constant 1 : i32
    %14 = arith.addi %1, %c1_i32 : i32
    %c0_8 = arith.constant 0 : index
    %15 = arith.index_cast %14 : i32 to index
    %c0_9 = arith.constant 0 : index
    %c0_10 = arith.constant 0 : index
    %16 = vector.load %arg2[%c0_8, %15, %c0_9, %c0_10] : memref<1x18x18x4xbf16, #tpu.memory_space<vmem>>, vector<1x16x16x4xbf16>
    %17 = vector.shape_cast %16 : vector<1x16x16x4xbf16> to vector<16x16x4xbf16>
    %c1_i32_11 = arith.constant 1 : i32
    %18 = arith.addi %1, %c1_i32_11 : i32
    %c0_12 = arith.constant 0 : index
    %19 = arith.index_cast %18 : i32 to index
    %c1_13 = arith.constant 1 : index
    %c0_14 = arith.constant 0 : index
    %20 = vector.load %arg2[%c0_12, %19, %c1_13, %c0_14] : memref<1x18x18x4xbf16, #tpu.memory_space<vmem>>, vector<1x16x16x4xbf16>
    %21 = vector.shape_cast %20 : vector<1x16x16x4xbf16> to vector<16x16x4xbf16>
    %c1_i32_15 = arith.constant 1 : i32
    %22 = arith.addi %1, %c1_i32_15 : i32
    %c0_16 = arith.constant 0 : index
    %23 = arith.index_cast %22 : i32 to index
    %c2_17 = arith.constant 2 : index
    %c0_18 = arith.constant 0 : index
    %24 = vector.load %arg2[%c0_16, %23, %c2_17, %c0_18] : memref<1x18x18x4xbf16, #tpu.memory_space<vmem>>, vector<1x16x16x4xbf16>
    %25 = vector.shape_cast %24 : vector<1x16x16x4xbf16> to vector<16x16x4xbf16>
    %c2_i32 = arith.constant 2 : i32
    %26 = arith.addi %1, %c2_i32 : i32
    %c0_19 = arith.constant 0 : index
    %27 = arith.index_cast %26 : i32 to index
    %c0_20 = arith.constant 0 : index
    %c0_21 = arith.constant 0 : index
    %28 = vector.load %arg2[%c0_19, %27, %c0_20, %c0_21] : memref<1x18x18x4xbf16, #tpu.memory_space<vmem>>, vector<1x16x16x4xbf16>
    %29 = vector.shape_cast %28 : vector<1x16x16x4xbf16> to vector<16x16x4xbf16>
    %c2_i32_22 = arith.constant 2 : i32
    %30 = arith.addi %1, %c2_i32_22 : i32
    %c0_23 = arith.constant 0 : index
    %31 = arith.index_cast %30 : i32 to index
    %c1_24 = arith.constant 1 : index
    %c0_25 = arith.constant 0 : index
    %32 = vector.load %arg2[%c0_23, %31, %c1_24, %c0_25] : memref<1x18x18x4xbf16, #tpu.memory_space<vmem>>, vector<1x16x16x4xbf16>
    %33 = vector.shape_cast %32 : vector<1x16x16x4xbf16> to vector<16x16x4xbf16>
    %c2_i32_26 = arith.constant 2 : i32
    %34 = arith.addi %1, %c2_i32_26 : i32
    %c0_27 = arith.constant 0 : index
    %35 = arith.index_cast %34 : i32 to index
    %c2_28 = arith.constant 2 : index
    %c0_29 = arith.constant 0 : index
    %36 = vector.load %arg2[%c0_27, %35, %c2_28, %c0_29] : memref<1x18x18x4xbf16, #tpu.memory_space<vmem>>, vector<1x16x16x4xbf16>
    %37 = vector.shape_cast %36 : vector<1x16x16x4xbf16> to vector<16x16x4xbf16>
    %38 = tpu.concatenate %5, %9, %13, %17, %21, %25, %29, %33, %37 in 2 : vector<16x16x4xbf16>, vector<16x16x4xbf16>, vector<16x16x4xbf16>, vector<16x16x4xbf16>, vector<16x16x4xbf16>, vector<16x16x4xbf16>, vector<16x16x4xbf16>, vector<16x16x4xbf16>, vector<16x16x4xbf16> -> vector<16x16x36xbf16>
    %39 = vector.shape_cast %38 : vector<16x16x36xbf16> to vector<256x36xbf16>
    %c0_30 = arith.constant 0 : index
    %c0_31 = arith.constant 0 : index
    %40 = vector.load %arg3[%c0_30, %c0_31] : memref<36x128xbf16, #tpu.memory_space<vmem>>, vector<36x128xbf16>
    %cst = arith.constant dense<0.000000e+00> : vector<256x128xf32>
    %41 = tpu.matmul %39, %40, %cst {dimension_numbers = #tpu.dot_dimension_numbers<[1], [0], [0], [1], [0, 0, 1, 1], [], []>} : vector<256x36xbf16>, vector<36x128xbf16>, vector<256x128xf32> -> vector<256x128xf32>
    %42 = vector.shape_cast %41 : vector<256x128xf32> to vector<16x16x128xf32>
    %c0_32 = arith.constant 0 : index
    %c0_33 = arith.constant 0 : index
    %c0_34 = arith.constant 0 : index
    %c0_35 = arith.constant 0 : index
    %43 = vector.load %arg4[%c0_32, %c0_33, %c0_34, %c0_35] : memref<1x16x16x128xf32, #tpu.memory_space<vmem>>, vector<1x16x16x128xf32>
    %44 = vector.shape_cast %43 : vector<1x16x16x128xf32> to vector<16x16x128xf32>
    %45 = vector.shape_cast %42 : vector<16x16x128xf32> to vector<1x16x16x128xf32>
    tpu.vector_store %arg4[%c0_32, %c0_33, %c0_34, %c0_35], %45 {strides = array<i32>} : memref<1x16x16x128xf32, #tpu.memory_space<vmem>>, vector<1x16x16x128xf32>,
    %cst_36 = arith.constant dense<0.000000e+00> : vector<128xf32>
    %46 = vector.multi_reduction <add>, %41, %cst_36 [0] : vector<256x128xf32> to vector<128xf32>
    %47 = vector.shape_cast %46 : vector<128xf32> to vector<1x128xf32>
    %48 = arith.mulf %41, %41 : vector<256x128xf32>
    %cst_37 = arith.constant dense<0.000000e+00> : vector<128xf32>
    %49 = vector.multi_reduction <add>, %48, %cst_37 [0] : vector<256x128xf32> to vector<128xf32>
    %50 = vector.shape_cast %49 : vector<128xf32> to vector<1x128xf32>
    %51 = tpu.concatenate %47, %50 in 0 : vector<1x128xf32>, vector<1x128xf32> -> vector<2x128xf32>
    %c0_38 = arith.constant 0 : index
    %c0_39 = arith.constant 0 : index
    %c0_40 = arith.constant 0 : index
    %c0_41 = arith.constant 0 : index
    %52 = vector.load %arg5[%c0_38, %c0_39, %c0_40, %c0_41] : memref<1x1x2x128xf32, #tpu.memory_space<vmem>>, vector<1x1x2x128xf32>
    %53 = vector.shape_cast %52 : vector<1x1x2x128xf32> to vector<2x128xf32>
    %54 = vector.shape_cast %51 : vector<2x128xf32> to vector<1x1x2x128xf32>
    tpu.vector_store %arg5[%c0_38, %c0_39, %c0_40, %c0_41], %54 {strides = array<i32>} : memref<1x1x2x128xf32, #tpu.memory_space<vmem>>, vector<1x1x2x128xf32>,
    return
  }
  func.func @transform_0(%arg0: i32, %arg1: i32) -> (i32, i32, i32, i32) {
    %c0_i32 = arith.constant 0 : i32
    %c0_i32_0 = arith.constant 0 : i32
    %c0_i32_1 = arith.constant 0 : i32
    %c0_i32_2 = arith.constant 0 : i32
    return %arg0, %c0_i32, %c0_i32_0, %c0_i32_1 : i32, i32, i32, i32
  }
  func.func @transform_1(%arg0: i32, %arg1: i32) -> (i32, i32) {
    %c0_i32 = arith.constant 0 : i32
    %c0_i32_0 = arith.constant 0 : i32
    %c0_i32_1 = arith.constant 0 : i32
    return %c0_i32, %c0_i32_0 : i32, i32
  }
  func.func @transform_2(%arg0: i32, %arg1: i32) -> (i32, i32, i32, i32) {
    %c0_i32 = arith.constant 0 : i32
    %c0_i32_0 = arith.constant 0 : i32
    %c0_i32_1 = arith.constant 0 : i32
    return %arg0, %arg1, %c0_i32, %c0_i32_0 : i32, i32, i32, i32
  }
  func.func @transform_3(%arg0: i32, %arg1: i32) -> (i32, i32, i32, i32) {
    %c0_i32 = arith.constant 0 : i32
    %c0_i32_0 = arith.constant 0 : i32
    %c0_i32_1 = arith.constant 0 : i32
    return %arg0, %arg1, %c0_i32, %c0_i32_0 : i32, i32, i32, i32
  }
}

module attributes {stable_mosaic.version = 11 : i64} {
  func.func @_bn_act_kernel(%arg0: i32, %arg1: i32, %arg2: memref<2x1x2x128xf32, #tpu.memory_space<vmem>>, %arg3: memref<1x128xf32, #tpu.memory_space<vmem>>, %arg4: memref<1x128xf32, #tpu.memory_space<vmem>>, %arg5: memref<1x16x16x128xf32, #tpu.memory_space<vmem>>, %arg6: memref<1x16x16x128xf32, #tpu.memory_space<vmem>>) attributes {dimension_semantics = [#tpu.dimension_semantics<parallel>, #tpu.dimension_semantics<parallel>], iteration_bounds = array<i64: 2, 1>, scalar_prefetch = 0 : i64, scratch_operands = 0 : i64, tpu.core_type = #tpu.core_type<tc>, window_params = [{pipeline_mode = #tpu.pipeline_mode<synchronous>, transform_indices = @transform_0, window_bounds = array<i64: 2, 1, 2, 128>}, {pipeline_mode = #tpu.pipeline_mode<synchronous>, transform_indices = @transform_1, window_bounds = array<i64: 1, 128>}, {pipeline_mode = #tpu.pipeline_mode<synchronous>, transform_indices = @transform_2, window_bounds = array<i64: 1, 128>}, {transform_indices = @transform_3, window_bounds = array<i64: 1, 16, 16, 128>}, {transform_indices = @transform_4, window_bounds = array<i64: 1, 16, 16, 128>}]} {
    %c0 = arith.constant 0 : index
    %c0_0 = arith.constant 0 : index
    %c0_1 = arith.constant 0 : index
    %c0_2 = arith.constant 0 : index
    %0 = vector.load %arg2[%c0, %c0_0, %c0_1, %c0_2] : memref<2x1x2x128xf32, #tpu.memory_space<vmem>>, vector<2x1x2x128xf32>
    %cst = arith.constant dense<0.000000e+00> : vector<2x128xf32>
    %1 = vector.multi_reduction <add>, %0, %cst [0, 1] : vector<2x1x2x128xf32> to vector<2x128xf32>
    %2 = vector.extract_strided_slice %1 {offsets = [0, 0], sizes = [1, 128], strides = [1, 1]} : vector<2x128xf32> to vector<1x128xf32>
    %cst_3 = arith.constant 0.001953125 : f32
    %3 = vector.broadcast %cst_3 : f32 to vector<1x128xf32>
    %4 = arith.mulf %2, %3 : vector<1x128xf32>
    %5 = vector.extract_strided_slice %1 {offsets = [1, 0], sizes = [1, 128], strides = [1, 1]} : vector<2x128xf32> to vector<1x128xf32>
    %cst_4 = arith.constant 0.001953125 : f32
    %6 = vector.broadcast %cst_4 : f32 to vector<1x128xf32>
    %7 = arith.mulf %5, %6 : vector<1x128xf32>
    %8 = arith.mulf %4, %4 : vector<1x128xf32>
    %9 = arith.subf %7, %8 : vector<1x128xf32>
    %c0_5 = arith.constant 0 : index
    %c0_6 = arith.constant 0 : index
    %10 = vector.load %arg3[%c0_5, %c0_6] : memref<1x128xf32, #tpu.memory_space<vmem>>, vector<1x128xf32>
    %cst_7 = arith.constant 1.000000e-03 : f32
    %11 = vector.broadcast %cst_7 : f32 to vector<1x128xf32>
    %12 = arith.addf %9, %11 : vector<1x128xf32>
    %13 = math.rsqrt %12 : vector<1x128xf32>
    %14 = arith.mulf %10, %13 : vector<1x128xf32>
    %c0_8 = arith.constant 0 : index
    %c0_9 = arith.constant 0 : index
    %15 = vector.load %arg4[%c0_8, %c0_9] : memref<1x128xf32, #tpu.memory_space<vmem>>, vector<1x128xf32>
    %16 = arith.mulf %4, %14 : vector<1x128xf32>
    %17 = arith.subf %15, %16 : vector<1x128xf32>
    %c0_10 = arith.constant 0 : index
    %c0_11 = arith.constant 0 : index
    %c0_12 = arith.constant 0 : index
    %c0_13 = arith.constant 0 : index
    %18 = vector.load %arg5[%c0_10, %c0_11, %c0_12, %c0_13] : memref<1x16x16x128xf32, #tpu.memory_space<vmem>>, vector<1x16x16x128xf32>
    %19 = vector.shape_cast %14 : vector<1x128xf32> to vector<1x1x1x128xf32>
    %20 = vector.broadcast %19 : vector<1x1x1x128xf32> to vector<1x16x16x128xf32>
    %21 = arith.mulf %18, %20 : vector<1x16x16x128xf32>
    %22 = vector.shape_cast %17 : vector<1x128xf32> to vector<1x1x1x128xf32>
    %23 = vector.broadcast %22 : vector<1x1x1x128xf32> to vector<1x16x16x128xf32>
    %24 = arith.addf %21, %23 : vector<1x16x16x128xf32>
    %25 = arith.negf %24 : vector<1x16x16x128xf32>
    %26 = math.exp %25 : vector<1x16x16x128xf32>
    %cst_14 = arith.constant 1.000000e+00 : f32
    %27 = vector.broadcast %cst_14 : f32 to vector<1x16x16x128xf32>
    %28 = arith.addf %27, %26 : vector<1x16x16x128xf32>
    %29 = arith.divf %27, %28 : vector<1x16x16x128xf32>
    %30 = arith.mulf %24, %29 : vector<1x16x16x128xf32>
    %c0_15 = arith.constant 0 : index
    %c0_16 = arith.constant 0 : index
    %c0_17 = arith.constant 0 : index
    %c0_18 = arith.constant 0 : index
    %31 = vector.load %arg6[%c0_15, %c0_16, %c0_17, %c0_18] : memref<1x16x16x128xf32, #tpu.memory_space<vmem>>, vector<1x16x16x128xf32>
    tpu.vector_store %arg6[%c0_15, %c0_16, %c0_17, %c0_18], %30 {strides = array<i32>} : memref<1x16x16x128xf32, #tpu.memory_space<vmem>>, vector<1x16x16x128xf32>,
    return
  }
  func.func @transform_0(%arg0: i32, %arg1: i32) -> (i32, i32, i32, i32) {
    %c0_i32 = arith.constant 0 : i32
    %c0_i32_0 = arith.constant 0 : i32
    %c0_i32_1 = arith.constant 0 : i32
    %c0_i32_2 = arith.constant 0 : i32
    %c0_i32_3 = arith.constant 0 : i32
    return %c0_i32, %c0_i32_0, %c0_i32_1, %c0_i32_2 : i32, i32, i32, i32
  }
  func.func @transform_1(%arg0: i32, %arg1: i32) -> (i32, i32) {
    %c0_i32 = arith.constant 0 : i32
    %c0_i32_0 = arith.constant 0 : i32
    %c0_i32_1 = arith.constant 0 : i32
    return %c0_i32, %c0_i32_0 : i32, i32
  }
  func.func @transform_2(%arg0: i32, %arg1: i32) -> (i32, i32) {
    %c0_i32 = arith.constant 0 : i32
    %c0_i32_0 = arith.constant 0 : i32
    %c0_i32_1 = arith.constant 0 : i32
    return %c0_i32, %c0_i32_0 : i32, i32
  }
  func.func @transform_3(%arg0: i32, %arg1: i32) -> (i32, i32, i32, i32) {
    %c0_i32 = arith.constant 0 : i32
    %c0_i32_0 = arith.constant 0 : i32
    %c0_i32_1 = arith.constant 0 : i32
    return %arg0, %arg1, %c0_i32, %c0_i32_0 : i32, i32, i32, i32
  }
  func.func @transform_4(%arg0: i32, %arg1: i32) -> (i32, i32, i32, i32) {
    %c0_i32 = arith.constant 0 : i32
    %c0_i32_0 = arith.constant 0 : i32
    %c0_i32_1 = arith.constant 0 : i32
    return %arg0, %arg1, %c0_i32, %c0_i32_0 : i32, i32, i32, i32
  }
}

</mosaic_0001>

<bundles_post_ra>
// kernel: conv_bn_forward.3
= control target key start
LH: loop header
LB: loop body
LE: loop exit
PB: predicated region body
PF: predicated region fallthrough
CT: control target
= control target key end

     0   :  { %s988_s15 = smov 0   ;;  %s990_s16 = smov 0   ;;  %s1304_s0 = inlined_call_operand.vmem [shape: f32[2,1,2,128], index: 0, kind: input, shape index: {}]   ;;  %s1305_s1 = inlined_call_operand.vmem [shape: f32[1,128], index: 1, kind: input, shape index: {}]   ;;  %s1306_s2 = inlined_call_operand.vmem [shape: f32[1,128], index: 2, kind: input, shape index: {}]   ;;  %s1307_s3 = inlined_call_operand.vmem [shape: f32[2,16,16,128], index: 3, kind: input, shape index: {}]   ;;  %s1308_s4 = inlined_call_operand.vmem [shape: f32[2,16,16,128], index: 4, kind: output, shape index: {}]  }
   0x1   :  { %s992_s17 = smov 0  }
   0x2 LB: > { %s26_s18 = sadd.s32 1, %s956_s16  ;;  %p742_p0 = scmp.ge.s32.totalorder %s960_s17, 1  ;;  %s960_s17 = sphi %s992_s17, %s14_s17   ;;  %s956_s16 = sphi %s990_s16, %s1310_s16   ;;  %s952_s15 = sphi %s988_s15, %s1309_s15  }
   0x3   : > { %p28_p1 = scmp.ge.s32.totalorder %s26_s18, 2  ;;  %p184_p2 = scmp.lt.s32.totalorder %s960_s17, 3 }
   0x5   : > { %s1312_s18 = smov (%p28_p1, %s26_s18), 0  ;;  %p185_p3 = pnand %p742_p0, %p184_p2 }
   0x6   : > { %p221_p4 = scmp.lt.s32.totalorder (!%p185_p3), %s952_s15, 1 }
   0x7   : > { %188 = sbr.rel (%p185_p3) target bundleno = 138 (0x8a), region = 36 }
   0xc   : > { %v242_v0 = vld [vmem:[%s1304_s0] sm:$0x3]  ;;  %v243_v1 = vld [vmem:[%s1304_s0 + $0x2] sm:$0x3]  ;;  %vm244_vm0 = vcmask 1041408   ;;  %v261_v12 = vlaneseq  ;;  %s1314_s15 = smov (!%p221_p4, %s952_s15), 1 }
   0xd   : > { %v245_v2 = vsel %vm244_vm0, %v242_v0, 0.0  ;;  %v246_v3 = vsel %vm244_vm0, %v243_v1, 0.0  ;;  %v962_v10 = vmov 1966171168   ;;  %s781_s23 = sshll.u32 %s1314_s15, 8 }
   0xe   : > { %v247_v4 = vadd.f32 %v246_v3, %v245_v2  ;;  %v259_v11 = vunpack.c.l.s4 %v962_v10  ;;  %v262_v14 = vshrl.u32 %v261_v12, 7  ;;  %v254_v19 = vld [vmem:[%s1305_s1] sm:$0x1]  ;;  %s1023_s28 = scalar_lea.vmem %s1307_s3, %s781_s23  ;;  %s1181_s7 = scalar_lea.vmem %s1308_s4, %s781_s23 }
   0xf   : > { %v275_v23 = vld [vmem:[%s1306_s2] sm:$0x1]  ;;  %v279_v25 = vld [vmem:[%s1023_s28 + $0x8] sm:$0xff]  ;;  %v280_v26 = vld [vmem:[%s1023_s28 + $0x10] sm:$0xff] }
  0x10   : > { %v248_v5 = vmul.f32 0.001953125, %v247_v4  ;;  %v260_v13 = vunpack.c.0.s8 %v259_v11  ;;  %v313_v21 = vsub.s32 0, %v262_v14  ;;  %v278_v24 = vld [vmem:[%s1023_s28] sm:$0xff]  ;;  %v281_v29 = vld [vmem:[%s1023_s28 + $0x18] sm:$0xff]  ;;  %v283_v31 = vld [vmem:[%s1023_s28 + $0x28] sm:$0xff] }
  0x11   : > { %v282_v30 = vld [vmem:[%s1023_s28 + $0x20] sm:$0xff]  ;;  %v284_v32 = vld [vmem:[%s1023_s28 + $0x30] sm:$0xff]  ;;  %v285_v37 = vld [vmem:[%s1023_s28 + $0x38] sm:$0xff] }
  0x12   : > { %v249_v6 = vmul.f32 %v248_v5, %v248_v5  ;;  %v263_v15 = vsub.s32 %v260_v13, %v262_v14  ;;  %v286_v38 = vld [vmem:[%s1023_s28 + $0x40] sm:$0xff]  ;;  %v287_v44 = vld [vmem:[%s1023_s28 + $0x48] sm:$0xff]  ;;  %v288_v45 = vld [vmem:[%s1023_s28 + $0x50] sm:$0xff] }
  0x13   : > { %v289_v52 = vld [vmem:[%s1023_s28 + $0x58] sm:$0xff]  ;;  %v290_v57 = vld [vmem:[%s1023_s28 + $0x60] sm:$0xff]  ;;  %v291_v58 = vld [vmem:[%s1023_s28 + $0x68] sm:$0xff] }
  0x14   : > { %v251_v7 = vrot.slane %v249_v6, 7  ;;  %v292_v2 = vld [vmem:[%s1023_s28 + $0x70] sm:$0xff]  ;;  %v293_v6 = vld [vmem:[%s1023_s28 + $0x78] sm:$0xff] }
  0x16   : > { %v253_v8 = vsub.f32 %v248_v5, %v251_v7 }
  0x18   : > { %v255_v9 = vadd.f32 0.001, %v253_v8 }
  0x1a   : > { %808 = vrsqrt.f32 %v255_v9 }
  0x27   : > { %v809_v16 = vpop.eup %808 }
  0x28   : > { %v264_v17 = vrot.slane %v809_v16, %v263_v15 }
  0x2a   : > { %v265_v18 = vcombine.high %v264_v17, %v264_v17 }
  0x2c   : > { %v272_v20 = vrot.slane %v265_v18, %v263_v15 }
  0x2e   : > { %v274_v22 = vmul.f32 %v272_v20, %v254_v19 }
  0x30   : > { %v276_v27 = vmul.f32 %v274_v22, %v248_v5  ;;  %v1031_v28 = vrot.slane %v274_v22, %v313_v21 }
  0x32   : > { %v277_v33 = vsub.f32 %v275_v23, %v276_v27  ;;  %v316_v34 = vmul.f32 %v1031_v28, %v278_v24  ;;  %v317_v35 = vmul.f32 %v1031_v28, %v279_v25  ;;  %v318_v36 = vmul.f32 %v1031_v28, %v280_v26 }
  0x33   : > { %v319_v39 = vmul.f32 %v1031_v28, %v281_v29  ;;  %v320_v40 = vmul.f32 %v1031_v28, %v282_v30  ;;  %v321_v41 = vmul.f32 %v1031_v28, %v283_v31  ;;  %v322_v43 = vmul.f32 %v1031_v28, %v284_v32  ;;  %v294_v29 = vld [vmem:[%s1023_s28 + $0x80] sm:$0xff]  ;;  %v295_v30 = vld [vmem:[%s1023_s28 + $0x88] sm:$0xff] }
  0x34   : > { %v1045_v42 = vrot.slane %v277_v33, %v313_v21  ;;  %v323_v46 = vmul.f32 %v1031_v28, %v285_v37  ;;  %v324_v47 = vmul.f32 %v1031_v28, %v286_v38  ;;  %v325_v55 = vmul.f32 %v1031_v28, %v287_v44  ;;  %v296_v38 = vld [vmem:[%s1023_s28 + $0x90] sm:$0xff] }
  0x35   : > { %v326_v56 = vmul.f32 %v1031_v28, %v288_v45  ;;  %v327_v1 = vmul.f32 %v1031_v28, %v289_v52  ;;  %v328_v5 = vmul.f32 %v1031_v28, %v290_v57  ;;  %v329_v9 = vmul.f32 %v1031_v28, %v291_v58  ;;  %v298_v45 = vld [vmem:[%s1023_s28 + $0xa0] sm:$0xff] }
  0x36   : > { %v1053_v48 = vadd.f32 %v1045_v42, %v316_v34  ;;  %v1056_v49 = vadd.f32 %v1045_v42, %v317_v35  ;;  %v1059_v50 = vadd.f32 %v1045_v42, %v318_v36  ;;  %v1062_v51 = vadd.f32 %v1045_v42, %v319_v39  ;;  %v297_v39 = vld [vmem:[%s1023_s28 + $0x98] sm:$0xff] }
  0x37   : > { %v1066_v53 = vadd.f32 %v1045_v42, %v320_v40  ;;  %v1069_v54 = vadd.f32 %v1045_v42, %v321_v41  ;;  %v1079_v62 = vadd.f32 %v1045_v42, %v322_v43  ;;  %v1083_v0 = vadd.f32 %v1045_v42, %v323_v46 }
  0x38   : > { %v747_v59 = vmul.f32 -1.442695, %v1053_v48  ;;  %v748_v60 = vmul.f32 -1.442695, %v1056_v49  ;;  %v749_v61 = vmul.f32 -1.442695, %v1059_v50  ;;  %v1089_v4 = vadd.f32 %v1045_v42, %v324_v47 }
  0x39   : > { %v750_v63 = vmul.f32 -1.442695, %v1062_v51  ;;  %v751_v3 = vmul.f32 -1.442695, %v1066_v53  ;;  %v752_v7 = vmul.f32 -1.442695, %v1069_v54  ;;  %v1095_v8 = vadd.f32 %v1045_v42, %v325_v55 }
  0x3a   : > { %810 = vpow2.f32 %v747_v59  ;;  %v753_v10 = vmul.f32 -1.442695, %v1079_v62  ;;  %v1100_v11 = vadd.f32 %v1045_v42, %v326_v56  ;;  %v330_v12 = vmul.f32 %v1031_v28, %v292_v2  ;;  %v299_v56 = vld [vmem:[%s1023_s28 + $0xa8] sm:$0xff] }
  0x3b   : > { %812 = vpow2.f32 %v748_v60  ;;  %v754_v13 = vmul.f32 -1.442695, %v1083_v0  ;;  %v1105_v14 = vadd.f32 %v1045_v42, %v327_v1  ;;  %v331_v15 = vmul.f32 %v1031_v28, %v293_v6  ;;  %v300_v6 = vld [vmem:[%s1023_s28 + $0xb0] sm:$0xff] }
  0x3c   : > { %814 = vpow2.f32 %v749_v61  ;;  %v755_v16 = vmul.f32 -1.442695, %v1089_v4  ;;  %v1110_v17 = vadd.f32 %v1045_v42, %v328_v5  ;;  %v756_v18 = vmul.f32 -1.442695, %v1095_v8 }
  0x3d   : > { %816 = vpow2.f32 %v750_v63  ;;  %v1114_v19 = vadd.f32 %v1045_v42, %v329_v9  ;;  %v757_v20 = vmul.f32 -1.442695, %v1100_v11  ;;  %v1118_v21 = vadd.f32 %v1045_v42, %v330_v12 }
  0x3e   : > { %818 = vpow2.f32 %v751_v3  ;;  %v758_v22 = vmul.f32 -1.442695, %v1105_v14  ;;  %v1122_v23 = vadd.f32 %v1045_v42, %v331_v15  ;;  %v759_v24 = vmul.f32 -1.442695, %v1110_v17 }
  0x3f   : > { %820 = vpow2.f32 %v752_v7  ;;  %v760_v25 = vmul.f32 -1.442695, %v1114_v19  ;;  %v761_v26 = vmul.f32 -1.442695, %v1118_v21  ;;  %v332_v36 = vmul.f32 %v1031_v28, %v294_v29  ;;  %v303_v29 = vld [vmem:[%s1023_s28 + $0xc8] sm:$0xff] }
  0x40   : > { %822 = vpow2.f32 %v753_v10  ;;  %v762_v27 = vmul.f32 -1.442695, %v1122_v23  ;;  %v333_v37 = vmul.f32 %v1031_v28, %v295_v30  ;;  %v334_v52 = vmul.f32 %v1031_v28, %v296_v38 }
  0x41   : > { %824 = vpow2.f32 %v754_v13  ;;  %v335_v55 = vmul.f32 %v1031_v28, %v297_v39  ;;  %v1139_v59 = vadd.f32 %v1045_v42, %v332_v36  ;;  %v336_v1 = vmul.f32 %v1031_v28, %v298_v45  ;;  %v301_v13 = vld [vmem:[%s1023_s28 + $0xb8] sm:$0xff] }
  0x42   : > { %826 = vpow2.f32 %v755_v16  ;;  %v1142_v60 = vadd.f32 %v1045_v42, %v333_v37  ;;  %v337_v5 = vmul.f32 %v1031_v28, %v299_v56  ;;  %v1148_v10 = vadd.f32 %v1045_v42, %v334_v52  ;;  %v305_v52 = vld [vmem:[%s1023_s28 + $0xd8] sm:$0xff] }
  0x43   : > { %828 = vpow2.f32 %v756_v18  ;;  %v1151_v12 = vadd.f32 %v1045_v42, %v335_v55  ;;  %v763_v18 = vmul.f32 -1.442695, %v1139_v59 }
  0x44   : > { %830 = vpow2.f32 %v757_v20  ;;  %v764_v20 = vmul.f32 -1.442695, %v1142_v60  ;;  %v765_v36 = vmul.f32 -1.442695, %v1148_v10 }
  0x45   : > { %832 = vpow2.f32 %v758_v22  ;;  %v302_v22 = vld [vmem:[%s1023_s28 + $0xc0] sm:$0xff] }
  0x46   : > { %834 = vpow2.f32 %v759_v24  ;;  %v340_v37 = vmul.f32 %v1031_v28, %v302_v22 }
  0x47   : > { %v811_v31 = vpop.eup %810  ;;  %836 = vpow2.f32 %v760_v25 }
  0x48   : > { %v813_v32 = vpop.eup %812  ;;  %v482_v33 = vadd.f32 1.0, %v811_v31  ;;  %838 = vpow2.f32 %v761_v26  ;;  %v1158_v26 = vadd.f32 %v1045_v42, %v336_v1 }
  0x49   : > { %v815_v34 = vpop.eup %814  ;;  %v483_v35 = vadd.f32 1.0, %v813_v32  ;;  %840 = vpow2.f32 %v762_v27  ;;  %v338_v27 = vmul.f32 %v1031_v28, %v300_v6  ;;  %v1163_v32 = vadd.f32 %v1045_v42, %v337_v5  ;;  %v307_v5 = vld [vmem:[%s1023_s28 + $0xe8] sm:$0xff] }
  0x4a   : > { %v817_v40 = vpop.eup %816  ;;  %842 = vrcp.f32 %v482_v33  ;;  %v484_v41 = vadd.f32 1.0, %v815_v34  ;;  %v339_v33 = vmul.f32 %v1031_v28, %v301_v13  ;;  %v343_v13 = vmul.f32 %v1031_v28, %v305_v52 }
  0x4b   : > { %v819_v43 = vpop.eup %818  ;;  %844 = vrcp.f32 %v483_v35  ;;  %v485_v44 = vadd.f32 1.0, %v817_v40  ;;  %v766_v40 = vmul.f32 -1.442695, %v1151_v12 }
  0x4c   : > { %v821_v46 = vpop.eup %820  ;;  %846 = vrcp.f32 %v484_v41  ;;  %v486_v47 = vadd.f32 1.0, %v819_v43  ;;  %v341_v41 = vmul.f32 %v1031_v28, %v303_v29  ;;  %v304_v43 = vld [vmem:[%s1023_s28 + $0xd0] sm:$0xff] }
  0x4d   : > { %v823_v57 = vpop.eup %822  ;;  %848 = vrcp.f32 %v485_v44  ;;  %v487_v58 = vadd.f32 1.0, %v821_v46  ;;  %v767_v46 = vmul.f32 -1.442695, %v1158_v26 }
  0x4e   : > { %v825_v61 = vpop.eup %824  ;;  %850 = vrcp.f32 %v486_v47  ;;  %v488_v63 = vadd.f32 1.0, %v823_v57  ;;  %v1173_v47 = vadd.f32 %v1045_v42, %v338_v27  ;;  %v768_v57 = vmul.f32 -1.442695, %v1163_v32 }
  0x4f   : > { %v827_v2 = vpop.eup %826  ;;  %852 = vrcp.f32 %v487_v58  ;;  %v489_v3 = vadd.f32 1.0, %v825_v61  ;;  %v1185_v58 = vadd.f32 %v1045_v42, %v339_v33  ;;  %v306_v61 = vld [vmem:[%s1023_s28 + $0xe0] sm:$0xff] }
  0x50   : > { %v829_v7 = vpop.eup %828  ;;  %854 = vrcp.f32 %v488_v63  ;;  %v490_v9 = vadd.f32 1.0, %v827_v2  ;;  %v1190_v2 = vadd.f32 %v1045_v42, %v340_v37  ;;  %v769_v22 = vmul.f32 -1.442695, %v1173_v47 }
  0x51   : > { %v831_v15 = vpop.eup %830  ;;  %856 = vrcp.f32 %v489_v3  ;;  %v491_v16 = vadd.f32 1.0, %v829_v7  ;;  %v342_v3 = vmul.f32 %v1031_v28, %v304_v43  ;;  %v770_v29 = vmul.f32 -1.442695, %v1185_v58 }
  0x52   : > { %v833_v24 = vpop.eup %832  ;;  %858 = vrcp.f32 %v490_v9  ;;  %v492_v25 = vadd.f32 1.0, %v831_v15  ;;  %v1196_v9 = vadd.f32 %v1045_v42, %v341_v41 }
  0x53   : > { %v835_v30 = vpop.eup %834  ;;  %860 = vrcp.f32 %v491_v16  ;;  %v493_v31 = vadd.f32 1.0, %v833_v24  ;;  %v344_v24 = vmul.f32 %v1031_v28, %v306_v61 }
  0x54   : > { %v837_v34 = vpop.eup %836  ;;  %862 = vrcp.f32 %v492_v25  ;;  %v494_v35 = vadd.f32 1.0, %v835_v30  ;;  %v309_v25 = vld [vmem:[%s1023_s28 + $0xf8] sm:$0xff]  ;;  %v345_v30 = vmul.f32 %v1031_v28, %v307_v5 }
  0x55   : > { %v839_v38 = vpop.eup %838  ;;  %864 = vrcp.f32 %v493_v31  ;;  %v495_v39 = vadd.f32 1.0, %v837_v34 }
  0x56   : > { %v841_v44 = vpop.eup %840  ;;  %866 = vrcp.f32 %v494_v35  ;;  %v496_v45 = vadd.f32 1.0, %v839_v38  ;;  %v347_v35 = vmul.f32 %v1031_v28, %v309_v25  ;;  %v1225_v38 = vadd.f32 %v1045_v42, %v344_v24 }
  0x57   : > { %v843_v55 = vpop.eup %842  ;;  %868 = vrcp.f32 %v495_v39  ;;  %v497_v56 = vadd.f32 1.0, %v841_v44 }
  0x58   : > { %v845_v63 = vpop.eup %844  ;;  %v578_v1 = vmul.f32 %v843_v55, %v1053_v48  ;;  %870 = vrcp.f32 %v496_v45  ;;  %v308_v48 = vld [vmem:[%s1023_s28 + $0xf0] sm:$0xff]  ;;  %v1243_v52 = vadd.f32 %v1045_v42, %v347_v35 }
  0x59   : > { %v847_v6 = vpop.eup %846  ;;  %v579_v7 = vmul.f32 %v845_v63, %v1056_v49  ;;  %872 = vrcp.f32 %v497_v56  ;;  %v346_v33 = vmul.f32 %v1031_v28, %v308_v48  ;;  %v1231_v28 = vadd.f32 %v1045_v42, %v345_v30 }
  0x5a   : > { %v849_v15 = vpop.eup %848  ;;  %610 = vst [vmem:[%s1181_s7] sm:$0xff] %v578_v1  ;;  %v580_v16 = vmul.f32 %v847_v6, %v1059_v50  ;;  %874 = vpow2.f32 %v763_v18  ;;  %v1212_v18 = vadd.f32 %v1045_v42, %v342_v3  ;;  %v775_v56 = vmul.f32 -1.442695, %v1225_v38 }
  0x5b   : > { %v851_v49 = vpop.eup %850  ;;  %611 = vst [vmem:[%s1181_s7 + $0x8] sm:$0xff] %v579_v7  ;;  %v581_v27 = vmul.f32 %v849_v15, %v1062_v51  ;;  %876 = vpow2.f32 %v764_v20  ;;  %v1218_v20 = vadd.f32 %v1045_v42, %v343_v13  ;;  %v1237_v44 = vadd.f32 %v1045_v42, %v346_v33 }
  0x5c   : > { %v853_v31 = vpop.eup %852  ;;  %612 = vst [vmem:[%s1181_s7 + $0x10] sm:$0xff] %v580_v16  ;;  %v582_v50 = vmul.f32 %v851_v49, %v1066_v53  ;;  %878 = vpow2.f32 %v765_v36  ;;  %v771_v36 = vmul.f32 -1.442695, %v1190_v2  ;;  %v773_v43 = vmul.f32 -1.442695, %v1212_v18 }
  0x5d   : > { %v855_v34 = vpop.eup %854  ;;  %613 = vst [vmem:[%s1181_s7 + $0x18] sm:$0xff] %v581_v27  ;;  %v583_v51 = vmul.f32 %v853_v31, %v1069_v54  ;;  %880 = vpow2.f32 %v766_v40  ;;  %v772_v40 = vmul.f32 -1.442695, %v1196_v9 }
  0x5e   : > { %v857_v37 = vpop.eup %856  ;;  %614 = vst [vmem:[%s1181_s7 + $0x20] sm:$0xff] %v582_v50  ;;  %v584_v53 = vmul.f32 %v855_v34, %v1079_v62  ;;  %882 = vpow2.f32 %v767_v46  ;;  %v774_v46 = vmul.f32 -1.442695, %v1218_v20 }
  0x5f   : > { %v859_v39 = vpop.eup %858  ;;  %615 = vst [vmem:[%s1181_s7 + $0x28] sm:$0xff] %v583_v51  ;;  %v585_v54 = vmul.f32 %v857_v37, %v1083_v0  ;;  %884 = vpow2.f32 %v768_v57 }
  0x60   : > { %v861_v41 = vpop.eup %860  ;;  %616 = vst [vmem:[%s1181_s7 + $0x30] sm:$0xff] %v584_v53  ;;  %v586_v62 = vmul.f32 %v859_v39, %v1089_v4  ;;  %886 = vpow2.f32 %v769_v22 }
  0x61   : > { %v863_v45 = vpop.eup %862  ;;  %617 = vst [vmem:[%s1181_s7 + $0x38] sm:$0xff] %v585_v54  ;;  %v587_v0 = vmul.f32 %v861_v41, %v1095_v8  ;;  %888 = vpow2.f32 %v770_v29  ;;  %v776_v8 = vmul.f32 -1.442695, %v1231_v28 }
  0x62   : > { %v865_v55 = vpop.eup %864  ;;  %618 = vst [vmem:[%s1181_s7 + $0x40] sm:$0xff] %v586_v62  ;;  %v588_v4 = vmul.f32 %v863_v45, %v1100_v11  ;;  %890 = vpow2.f32 %v771_v36  ;;  %v777_v11 = vmul.f32 -1.442695, %v1237_v44 }
  0x63   : > { %v867_v57 = vpop.eup %866  ;;  %619 = vst [vmem:[%s1181_s7 + $0x48] sm:$0xff] %v587_v0  ;;  %v589_v61 = vmul.f32 %v865_v55, %v1105_v14  ;;  %892 = vpow2.f32 %v772_v40  ;;  %v778_v14 = vmul.f32 -1.442695, %v1243_v52 }
  0x64   : > { %v869_v63 = vpop.eup %868  ;;  %620 = vst [vmem:[%s1181_s7 + $0x50] sm:$0xff] %v588_v4  ;;  %v590_v42 = vmul.f32 %v867_v57, %v1110_v17  ;;  %894 = vpow2.f32 %v773_v43 }
  0x65   : > { %v871_v1 = vpop.eup %870  ;;  %621 = vst [vmem:[%s1181_s7 + $0x58] sm:$0xff] %v589_v61  ;;  %v591_v3 = vmul.f32 %v869_v63, %v1114_v19  ;;  %896 = vpow2.f32 %v774_v46 }
  0x66   : > { %v873_v5 = vpop.eup %872  ;;  %622 = vst [vmem:[%s1181_s7 + $0x60] sm:$0xff] %v590_v42  ;;  %v592_v6 = vmul.f32 %v871_v1, %v1118_v21  ;;  %898 = vpow2.f32 %v775_v56 }
  0x67   : > { %v875_v7 = vpop.eup %874  ;;  %623 = vst [vmem:[%s1181_s7 + $0x68] sm:$0xff] %v591_v3  ;;  %v593_v17 = vmul.f32 %v873_v5, %v1122_v23  ;;  %900 = vpow2.f32 %v776_v8 }
  0x68   : > { %v877_v13 = vpop.eup %876  ;;  %624 = vst [vmem:[%s1181_s7 + $0x70] sm:$0xff] %v592_v6  ;;  %v498_v48 = vadd.f32 1.0, %v875_v7  ;;  %902 = vpow2.f32 %v777_v11 }
  0x69   : > { %v879_v15 = vpop.eup %878  ;;  %625 = vst [vmem:[%s1181_s7 + $0x78] sm:$0xff] %v593_v17  ;;  %v499_v19 = vadd.f32 1.0, %v877_v13  ;;  %904 = vpow2.f32 %v778_v14 }
  0x6a   : > { %v881_v16 = vpop.eup %880  ;;  %906 = vrcp.f32 %v498_v48  ;;  %v500_v22 = vadd.f32 1.0, %v879_v15 }
  0x6b   : > { %v883_v24 = vpop.eup %882  ;;  %908 = vrcp.f32 %v499_v19  ;;  %v501_v21 = vadd.f32 1.0, %v881_v16 }
  0x6c   : > { %v885_v25 = vpop.eup %884  ;;  %910 = vrcp.f32 %v500_v22  ;;  %v502_v49 = vadd.f32 1.0, %v883_v24 }
  0x6d   : > { %v887_v27 = vpop.eup %886  ;;  %912 = vrcp.f32 %v501_v21  ;;  %v503_v23 = vadd.f32 1.0, %v885_v25 }
  0x6e   : > { %v889_v29 = vpop.eup %888  ;;  %914 = vrcp.f32 %v502_v49  ;;  %v504_v30 = vadd.f32 1.0, %v887_v27 }
  0x6f   : > { %v891_v31 = vpop.eup %890  ;;  %916 = vrcp.f32 %v503_v23  ;;  %v505_v50 = vadd.f32 1.0, %v889_v29 }
  0x70   : > { %v893_v33 = vpop.eup %892  ;;  %918 = vrcp.f32 %v504_v30  ;;  %v506_v34 = vadd.f32 1.0, %v891_v31 }
  0x71   : > { %v895_v51 = vpop.eup %894  ;;  %920 = vrcp.f32 %v505_v50  ;;  %v507_v35 = vadd.f32 1.0, %v893_v33 }
  0x72   : > { %v897_v37 = vpop.eup %896  ;;  %922 = vrcp.f32 %v506_v34  ;;  %v508_v53 = vadd.f32 1.0, %v895_v51 }
  0x73   : > { %v899_v36 = vpop.eup %898  ;;  %924 = vrcp.f32 %v507_v35  ;;  %v509_v39 = vadd.f32 1.0, %v897_v37 }
  0x74   : > { %v901_v54 = vpop.eup %900  ;;  %926 = vrcp.f32 %v508_v53  ;;  %v510_v40 = vadd.f32 1.0, %v899_v36 }
  0x75   : > { %v903_v41 = vpop.eup %902  ;;  %928 = vrcp.f32 %v509_v39  ;;  %v511_v62 = vadd.f32 1.0, %v901_v54 }
  0x76   : > { %v905_v43 = vpop.eup %904  ;;  %930 = vrcp.f32 %v510_v40  ;;  %v512_v45 = vadd.f32 1.0, %v903_v41 }
  0x77   : > { %v907_v0 = vpop.eup %906  ;;  %932 = vrcp.f32 %v511_v62  ;;  %v513_v46 = vadd.f32 1.0, %v905_v43 }
  0x78   : > { %v909_v55 = vpop.eup %908  ;;  %v594_v4 = vmul.f32 %v907_v0, %v1139_v59  ;;  %934 = vrcp.f32 %v512_v45 }
  0x79   : > { %v911_v56 = vpop.eup %910  ;;  %v595_v57 = vmul.f32 %v909_v55, %v1142_v60  ;;  %936 = vrcp.f32 %v513_v46 }
  0x7a   : > { %v913_v61 = vpop.eup %912  ;;  %626 = vst [vmem:[%s1181_s7 + $0x80] sm:$0xff] %v594_v4  ;;  %v596_v8 = vmul.f32 %v911_v56, %v1148_v10 }
  0x7b   : > { %v915_v63 = vpop.eup %914  ;;  %627 = vst [vmem:[%s1181_s7 + $0x88] sm:$0xff] %v595_v57  ;;  %v597_v42 = vmul.f32 %v913_v61, %v1151_v12 }
  0x7c   : > { %v917_v11 = vpop.eup %916  ;;  %628 = vst [vmem:[%s1181_s7 + $0x90] sm:$0xff] %v596_v8  ;;  %v598_v59 = vmul.f32 %v915_v63, %v1158_v26 }
  0x7d   : > { %v919_v1 = vpop.eup %918  ;;  %629 = vst [vmem:[%s1181_s7 + $0x98] sm:$0xff] %v597_v42  ;;  %v599_v60 = vmul.f32 %v917_v11, %v1163_v32 }
  0x7e   : > { %v921_v3 = vpop.eup %920  ;;  %630 = vst [vmem:[%s1181_s7 + $0xa0] sm:$0xff] %v598_v59  ;;  %v600_v10 = vmul.f32 %v919_v1, %v1173_v47 }
  0x7f   : > { %v923_v14 = vpop.eup %922  ;;  %631 = vst [vmem:[%s1181_s7 + $0xa8] sm:$0xff] %v599_v60  ;;  %v601_v12 = vmul.f32 %v921_v3, %v1185_v58 }
  0x80   : > { %v925_v5 = vpop.eup %924  ;;  %632 = vst [vmem:[%s1181_s7 + $0xb0] sm:$0xff] %v600_v10  ;;  %v602_v26 = vmul.f32 %v923_v14, %v1190_v2 }
  0x81   : > { %v927_v6 = vpop.eup %926  ;;  %633 = vst [vmem:[%s1181_s7 + $0xb8] sm:$0xff] %v601_v12  ;;  %v603_v32 = vmul.f32 %v925_v5, %v1196_v9 }
  0x82   : > { %v929_v7 = vpop.eup %928  ;;  %634 = vst [vmem:[%s1181_s7 + $0xc0] sm:$0xff] %v602_v26  ;;  %v604_v47 = vmul.f32 %v927_v6, %v1212_v18 }
  0x83   : > { %v931_v17 = vpop.eup %930  ;;  %635 = vst [vmem:[%s1181_s7 + $0xc8] sm:$0xff] %v603_v32  ;;  %v605_v58 = vmul.f32 %v929_v7, %v1218_v20 }
  0x84   : > { %v933_v13 = vpop.eup %932  ;;  %636 = vst [vmem:[%s1181_s7 + $0xd0] sm:$0xff] %v604_v47  ;;  %v606_v2 = vmul.f32 %v931_v17, %v1225_v38 }
  0x85   : > { %v935_v48 = vpop.eup %934  ;;  %637 = vst [vmem:[%s1181_s7 + $0xd8] sm:$0xff] %v605_v58  ;;  %v607_v15 = vmul.f32 %v933_v13, %v1231_v28 }
  0x86   : > { %v937_v9 = vpop.eup %936  ;;  %638 = vst [vmem:[%s1181_s7 + $0xe0] sm:$0xff] %v606_v2  ;;  %v608_v19 = vmul.f32 %v935_v48, %v1237_v44 }
  0x87   : > { %639 = vst [vmem:[%s1181_s7 + $0xe8] sm:$0xff] %v607_v15  ;;  %v609_v18 = vmul.f32 %v937_v9, %v1243_v52 }
  0x88   : > { %640 = vst [vmem:[%s1181_s7 + $0xf0] sm:$0xff] %v608_v19 }
  0x89   : > { %641 = vst [vmem:[%s1181_s7 + $0xf8] sm:$0xff] %v609_v18 }
  0x8a PF: > { %s14_s17 = sadd.s32 1, %s960_s17   ;;  %s1309_s15 = smov %s956_s16 }
  0x8b   : > { %p11_p5 = scmp.ge.s32.totalorder %s14_s17, 4   ;;  %s1310_s16 = smov %s1312_s18 }
  0x8d   :  { %13 = sbr.rel (!%p11_p5) target bundleno = 2 (0x2), region = 66 }

// kernel: conv_bn_forward.2
= control target key start
LH: loop header
LB: loop body
LE: loop exit
PB: predicated region body
PF: predicated region fallthrough
CT: control target
= control target key end

     0   :  { %s3287_s12 = smov 0   ;;  %s3289_s13 = smov 0   ;;  %s4422_s0 = inlined_call_operand.vmem [shape: bf16[2,18,18,4], index: 0, kind: input, shape index: {}]   ;;  %s4423_s1 = inlined_call_operand.vmem [shape: bf16[36,128], index: 1, kind: input, shape index: {}]   ;;  %s4424_s2 = inlined_call_operand.vmem [shape: f32[2,16,16,128], index: 2, kind: output, shape index: {0}]   ;;  %s4425_s3 = inlined_call_operand.vmem [shape: f32[2,1,2,128], index: 3, kind: output, shape index: {1}]  }
   0x1   :  { %s3291_s14 = smov 0  }
   0x2 LB: > { %s26_s15 = sadd.s32 1, %s3253_s13  ;;  %p2691_p0 = scmp.ge.s32.totalorder %s3257_s14, 1  ;;  %s3257_s14 = sphi %s3291_s14, %s14_s14   ;;  %s3253_s13 = sphi %s3289_s13, %s4427_s13   ;;  %s3249_s12 = sphi %s3287_s12, %s4426_s12  }
   0x3   : > { %p28_p1 = scmp.ge.s32.totalorder %s26_s15, 2  ;;  %p156_p2 = scmp.lt.s32.totalorder %s3257_s14, 3 }
   0x5   : > { %s4429_s15 = smov (%p28_p1, %s26_s15), 0  ;;  %p157_p3 = pnand %p2691_p0, %p156_p2 }
   0x6   : > { %p192_p4 = scmp.lt.s32.totalorder (!%p157_p3), %s3249_s12, 1  ;;  %s3259_s20 = smov (!%p157_p3), 12  }
   0x7   : > { %160 = sbr.rel (%p157_p3) target bundleno = 613 (0x265), region = 28  ;;  %s3260_s21 = smov (!%p157_p3), 20  }
   0x8   : > { %s3261_s22 = smov (!%p157_p3), 8   ;;  %s3262_s23 = smov (!%p157_p3), 4  }
   0x9   : > { %s3263_s24 = smov (!%p157_p3), 16   ;;  %s3264_s25 = smov (!%p157_p3), 24  }
   0xa   : > { %s3265_s26 = smov (!%p157_p3), 28   ;;  %s3266_s27 = smov (!%p157_p3), 32  }
   0xc   : > { %s4431_s12 = smov (!%p192_p4, %s3249_s12), 1  ;;  %vm821_vm0 = vcmask 1046528   ;;  %vm548_vm1 = vsmask.f32 7424  ;;  %vm2243_vm2 = vcmask 1041408   ;;  %vm1926_vm3 = vcmask 31744  }
   0xd   : > { %s3055_s16 = smul.u32 216, %s4431_s12  ;;  %vm1959_vm4 = vcmask 64512   ;;  %vm1992_vm5 = vcmask 97280   ;;  %vm2025_vm6 = vcmask 130048   ;;  %vm2058_vm7 = vcmask 162816   ;;  %s2989_s7 = sshll.u32 %s4431_s12, 8 }
   0xe   : > { %vm2091_vm8 = vcmask 195584   ;;  %vm2124_vm9 = vcmask 228352   ;;  %vm2157_vm10 = vcmask 261120   ;;  %vm2210_vm11 = vcmask 293888   ;;  %s4353_s10 = scalar_lea.vmem %s4424_s2, %s2989_s7  ;;  %s2695_s11 = sshll.u32 %s4431_s12, 1 }
   0xf   : > { %s3311_s19 = scalar_lea.vmem %s4422_s0, %s3055_s16  ;;  %vm2546_vm12 = vcmask 1040384   ;;  %s214_s18 = scalar_lea.vmem %s4425_s3, %s2695_s11 }
  0x10   : > { %v2698_v0 = vld [vmem:[%s3311_s19 + $0x18] sm:$0xf]  ;;  %v2699_v1 = vld [vmem:[%s3311_s19 + $0x1c] sm:$0xf]  ;;  %v2696_v5 = vld [vmem:[%s3311_s19 + $0xc] sm:$0xf] }
  0x11   : > { %v2745_v2 = vld [vmem:[%s3311_s19 + $0x18] sm:$0xe]  ;;  %v3316_v3 = vcombine.low %v2698_v0, %v2699_v1  ;;  %v2697_v6 = vld [vmem:[%s3311_s19 + $0x10] sm:$0xf]  ;;  %v2744_v7 = vld [vmem:[%s3311_s19 + $0xc] sm:$0xe] }
  0x12   : > { %v2905_v4 = vcombine.low %v2745_v2, %v2699_v1  ;;  %v3321_v8 = vcombine.low %v2696_v5, %v2697_v6  ;;  %v2904_v9 = vcombine.low %v2744_v7, %v2697_v6  ;;  %v3324_v10 = vld [vmem:[%s3311_s19 + $0x14] ss:$0 sps:$4 sm:$0x11]   ;;  %v221_v12 = vld [vmem:[%s3311_s19 + $0x4] sm:$0xf] }
  0x13   : > { %984 = vrot.lane.b32.xlu1 %v3316_v3, %s3259_s20  ;;  %v1077_v11 = vshll.u32 %v3316_v3, 16  ;;  %v1335_v15 = vrot.slane %v3324_v10, 1  ;;  %v268_v16 = vld [vmem:[%s3311_s19] sm:$0xe]  ;;  %v1075_v21 = vshrl.u32 %v3316_v3, 16  ;;  %v1070_v59 = vshll.u32 %v3324_v10, 16 }
  0x14   : > { %982 = vrot.lane.b32.xlu0 %v3321_v8, %s3259_s20  ;;  %v1065_v13 = vshll.u32 %v3321_v8, 16  ;;  %v1334_v14 = vrot.slane %v2904_v9, 1  ;;  %v1337_v17 = vrot.slane %v2905_v4, 1  ;;  %v3093_v18 = vld [vmem:[%s3311_s19 + $0x8] ss:$0 sps:$4 sm:$0x11]   ;;  %v2856_v19 = vcombine.low %v268_v16, %v221_v12 }
  0x15   : > { %v220_v20 = vld [vmem:[%s3311_s19] sm:$0xf]  ;;  %v222_v24 = vld [vmem:[%s3311_s19 + $0xc] sm:$0xf]  ;;  %v223_v25 = vld [vmem:[%s3311_s19 + $0x10] sm:$0xf] }
  0x16   : > { %v1336_v22 = vsel %vm821_vm0, %v1334_v14, %v1335_v15  ;;  %v3339_v23 = vcombine.low %v220_v20, %v221_v12  ;;  %v822_v26 = vrot.slane %v2856_v19, 1  ;;  %v823_v27 = vrot.slane %v3093_v18, 1  ;;  %v269_v28 = vld [vmem:[%s3311_s19 + $0xc] sm:$0xe]  ;;  %v2762_v43 = vld [vmem:[%s3311_s19 + $0x24] sm:$0xf] }
  0x17   : > { %v3344_v29 = vcombine.low %v222_v24, %v223_v25  ;;  %v557_v30 = vshll.u32 %v3093_v18, 16  ;;  %v3097_v31 = vld [vmem:[%s3311_s19 + $0x14] ss:$0 sps:$4 sm:$0x11]   ;;  %v2857_v32 = vcombine.low %v269_v28, %v223_v25  ;;  %v1079_v35 = vrot.slane %v1077_v11, 1 }
  0x18   : > { %1382 = vrot.lane.b32.xlu0 %v1336_v22, %s3260_s21  ;;  %v550_v33 = vshrl.u32 %v3339_v23, 16  ;;  %v552_v34 = vshll.u32 %v3339_v23, 16  ;;  %v824_v36 = vsel %vm821_vm0, %v822_v26, %v823_v27  ;;  %v3099_v38 = vld [vmem:[%s3311_s19 + $0x20] ss:$0 sps:$4 sm:$0x11]   ;;  %v826_v40 = vrot.slane %v3097_v31, 1 }
  0x19   : > { %v559_v37 = vrot.slane %v557_v30, 1  ;;  %870 = vrot.lane.b32.xlu1 %v824_v36, %s3261_s22  ;;  %v825_v39 = vrot.slane %v2857_v32, 1  ;;  %v562_v42 = vshrl.u32 %v3344_v29, 16  ;;  %v1338_v44 = vrot.slane %v3099_v38, 1  ;;  %v3357_v48 = vld [vmem:[%s3311_s19 + $0x28] sm:$0xf] }
  0x1a   : > { %v554_v41 = vrot.slane %v552_v34, 1  ;;  %v564_v45 = vshll.u32 %v3344_v29, 16  ;;  %v569_v46 = vshll.u32 %v3097_v31, 16  ;;  %v1082_v47 = vshll.u32 %v3099_v38, 16  ;;  %v2760_v53 = vld [vmem:[%s3311_s19 + $0x18] sm:$0xf] }
  0x1b   : > { %v827_v49 = vsel %vm821_vm0, %v825_v39, %v826_v40  ;;  %v1063_v51 = vshrl.u32 %v3321_v8, 16  ;;  %v1067_v52 = vrot.slane %v1065_v13, 1  ;;  %v2761_v56 = vld [vmem:[%s3311_s19 + $0x1c] sm:$0xf]  ;;  %v1080_v58 = vor.u32 %v1079_v35, %v1075_v21  ;;  %v2808_v7 = vld [vmem:[%s3311_s19 + $0x18] sm:$0xe] }
  0x1c   : > { %v555_v50 = vor.u32 %v554_v41, %v550_v33  ;;  %v566_v54 = vrot.slane %v564_v45, 1  ;;  %v571_v55 = vrot.slane %v569_v46, 1  ;;  %v2921_v60 = vcombine.low %v2762_v43, %v3357_v48  ;;  %v3370_v1 = vld [vmem:[%s3311_s19 + $0x2c] ss:$0 sps:$4 sm:$0x11]  }
  0x1d   : > { %872 = vrot.lane.b32.xlu1 %v827_v49, %s3261_s22  ;;  %v1339_v61 = vsel %vm821_vm0, %v1337_v17, %v1338_v44  ;;  %v1084_v63 = vrot.slane %v1082_v47, 1  ;;  %v2920_v0 = vcombine.low %v2760_v53, %v2761_v56  ;;  %v1068_v2 = vor.u32 %v1067_v52, %v1063_v51  ;;  %v3105_v5 = vld [vmem:[%s3311_s19 + $0x20] ss:$0 sps:$4 sm:$0x11]   ;;  %v224_v10 = vld [vmem:[%s3311_s19 + $0x18] sm:$0xf] }
  0x1e   : > { %v560_v57 = vsel %vm548_vm1, %v555_v50, %v559_v37  ;;  %v567_v62 = vor.u32 %v566_v54, %v562_v42  ;;  %v1072_v3 = vrot.slane %v1070_v59, 1  ;;  %v1589_v4 = vshll.u32 %v2921_v60, 16  ;;  %v3379_v13 = vld [vmem:[%s3311_s19 + $0x1c] sm:$0xf]  ;;  %v226_v21 = vld [vmem:[%s3311_s19 + $0x24] sm:$0xf] }
  0x1f   : > { %741 = vrot.lane.b32.xlu0 %v560_v57, %s3262_s23  ;;  %v1577_v8 = vshll.u32 %v2920_v0, 16  ;;  %v1587_v9 = vshrl.u32 %v2921_v60, 16  ;;  %v1594_v12 = vshll.u32 %v3370_v1, 16  ;;  %v1085_v14 = vsel %vm548_vm1, %v1080_v58, %v1084_v63  ;;  %v3387_v17 = vld [vmem:[%s3311_s19 + $0x20] ss:$0 sps:$4 sm:$0x11]  }
  0x20   : > { %v572_v6 = vsel %vm548_vm1, %v567_v62, %v571_v55  ;;  %v1591_v11 = vrot.slane %v1589_v4, 1  ;;  %v1575_v15 = vshrl.u32 %v2920_v0, 16  ;;  %v3384_v16 = vcombine.low %v224_v10, %v3379_v13  ;;  %v227_v22 = vld [vmem:[%s3311_s19 + $0x28] sm:$0xf]  ;;  %v2809_v37 = vld [vmem:[%s3311_s19 + $0x24] sm:$0xe] }
  0x21   : > { %1384 = vrot.lane.b32.xlu1 %v1339_v61, %s3260_s21  ;;  %v1073_v18 = vsel %vm548_vm1, %v1068_v2, %v1072_v3  ;;  %v1579_v19 = vrot.slane %v1577_v8, 1  ;;  %v1582_v20 = vshll.u32 %v3105_v5, 16  ;;  %v2952_v24 = vcombine.low %v2808_v7, %v2761_v56  ;;  %v3109_v33 = vld [vmem:[%s3311_s19 + $0x2c] ss:$0 sps:$4 sm:$0x11]  }
  0x22   : > { %v576_v25 = vshll.u32 %v3384_v16, 16  ;;  %v1592_v26 = vor.u32 %v1591_v11, %v1587_v9  ;;  %v1596_v27 = vrot.slane %v1594_v12, 1  ;;  %v581_v28 = vshll.u32 %v3387_v17, 16  ;;  %v271_v42 = vld [vmem:[%s3311_s19 + $0x24] sm:$0xe] }
  0x23   : > { %743 = vrot.lane.b32.xlu0 %v572_v6, %s3262_s23  ;;  %v3395_v30 = vcombine.low %v226_v21, %v227_v22  ;;  %v574_v31 = vshrl.u32 %v3384_v16, 16  ;;  %v1580_v34 = vor.u32 %v1579_v19, %v1575_v15  ;;  %v1584_v35 = vrot.slane %v1582_v20, 1  ;;  %v270_v47 = vld [vmem:[%s3311_s19 + $0x18] sm:$0xe]  ;;  %v2702_v51 = vld [vmem:[%s3311_s19 + $0x30] sm:$0xf] }
  0x24   : > { %v578_v32 = vrot.slane %v576_v25, 1  ;;  %v1597_v38 = vsel %vm548_vm1, %v1592_v26, %v1596_v27  ;;  %v583_v39 = vrot.slane %v581_v28, 1  ;;  %v1846_v40 = vrot.slane %v2952_v24, 1  ;;  %v2703_v52 = vld [vmem:[%s3311_s19 + $0x34] sm:$0xf] }
  0x25   : > { %1256 = vrot.lane.b32.xlu1 %v1085_v14, %s3263_s24  ;;  %v588_v36 = vshll.u32 %v3395_v30, 16  ;;  %v1847_v41 = vrot.slane %v3105_v5, 1  ;;  %v586_v44 = vshrl.u32 %v3395_v30, 16  ;;  %v593_v46 = vshll.u32 %v3109_v33, 16  ;;  %v2700_v53 = vld [vmem:[%s3311_s19 + $0x24] sm:$0xf] }
  0x26   : > { %v579_v43 = vor.u32 %v578_v32, %v574_v31  ;;  %v2953_v49 = vcombine.low %v2809_v37, %v3357_v48  ;;  %v1585_v50 = vsel %vm548_vm1, %v1580_v34, %v1584_v35  ;;  %v2701_v54 = vld [vmem:[%s3311_s19 + $0x28] sm:$0xf]  ;;  %v2859_v56 = vcombine.low %v271_v42, %v227_v22  ;;  %v3117_v9 = vld [vmem:[%s3311_s19 + $0x2c] ss:$0 sps:$4 sm:$0x11]  }
  0x27   : > { %1254 = vrot.lane.b32.xlu0 %v1073_v18, %s3263_s24  ;;  %v590_v45 = vrot.slane %v588_v36, 1  ;;  %v1848_v55 = vsel %vm821_vm0, %v1846_v40, %v1847_v41  ;;  %v595_v59 = vrot.slane %v593_v46, 1  ;;  %v2875_v48 = vcombine.low %v2702_v51, %v2703_v52  ;;  %v2747_v10 = vld [vmem:[%s3311_s19 + $0x30] sm:$0xe]  ;;  %v2746_v11 = vld [vmem:[%s3311_s19 + $0x24] sm:$0xe] }
  0x28   : > { %v584_v57 = vsel %vm548_vm1, %v579_v43, %v583_v39  ;;  %v1850_v61 = vrot.slane %v3370_v1, 1  ;;  %v2858_v62 = vcombine.low %v270_v47, %v3379_v13  ;;  %v2874_v63 = vcombine.low %v2700_v53, %v2701_v54  ;;  %v2766_v19 = vld [vmem:[%s3311_s19 + $0x3c] sm:$0xf]  ;;  %v3437_v20 = vld [vmem:[%s3311_s19 + $0x40] sm:$0xf] }
  0x29   : > { %1496 = vrot.lane.b32.xlu1 %v2921_v60, %s3264_s25  ;;  %v591_v58 = vor.u32 %v590_v45, %v586_v44  ;;  %v1849_v60 = vrot.slane %v2953_v49, 1  ;;  %v831_v3 = vrot.slane %v2859_v56, 1  ;;  %v832_v4 = vrot.slane %v3109_v33, 1  ;;  %v2764_v24 = vld [vmem:[%s3311_s19 + $0x30] sm:$0xf] }
  0x2a   : > { %v1101_v5 = vshll.u32 %v2875_v48, 16  ;;  %v828_v6 = vrot.slane %v2858_v62, 1  ;;  %v829_v7 = vrot.slane %v3387_v17, 1  ;;  %v1089_v8 = vshll.u32 %v2874_v63, 16  ;;  %v2765_v25 = vld [vmem:[%s3311_s19 + $0x34] sm:$0xf] }
  0x2b   : > { %1494 = vrot.lane.b32.xlu0 %v2920_v0, %s3264_s25  ;;  %v3422_v0 = vld [vmem:[%s3311_s19 + $0x38] ss:$0 sps:$4 sm:$0x11]   ;;  %v596_v2 = vsel %vm548_vm1, %v591_v58, %v595_v59  ;;  %v1851_v1 = vsel %vm821_vm0, %v1849_v60, %v1850_v61  ;;  %v1099_v12 = vshrl.u32 %v2875_v48, 16  ;;  %v833_v14 = vsel %vm821_vm0, %v831_v3, %v832_v4  ;;  %v228_v36 = vld [vmem:[%s3311_s19 + $0x30] sm:$0xf] }
  0x2c   : > { %v1106_v13 = vshll.u32 %v3422_v0, 16  ;;  %v1103_v15 = vrot.slane %v1101_v5, 1  ;;  %v1087_v18 = vshrl.u32 %v2874_v63, 16  ;;  %v830_v17 = vsel %vm821_vm0, %v828_v6, %v829_v7  ;;  %v3447_v37 = vld [vmem:[%s3311_s19 + $0x34] sm:$0xf] }
  0x2d   : > { %1768 = vrot.lane.b32.xlu1 %v1597_v38, %s3265_s26  ;;  %v1091_v21 = vrot.slane %v1089_v8, 1  ;;  %v1094_v22 = vshll.u32 %v3117_v9, 16  ;;  %v2907_v26 = vcombine.low %v2747_v10, %v2703_v52  ;;  %v2906_v27 = vcombine.low %v2746_v11, %v2701_v54  ;;  %v3452_v43 = vld [vmem:[%s3311_s19 + $0x44] ss:$0 sps:$4 sm:$0x11]  }
  0x2e   : > { %v2923_v28 = vcombine.low %v2766_v19, %v3437_v20  ;;  %v1104_v31 = vor.u32 %v1103_v15, %v1099_v12  ;;  %v1108_v32 = vrot.slane %v1106_v13, 1  ;;  %v2922_v33 = vcombine.low %v2764_v24, %v2765_v25  ;;  %v3123_v46 = vld [vmem:[%s3311_s19 + $0x38] ss:$0 sps:$4 sm:$0x11]   ;;  %v231_v51 = vld [vmem:[%s3311_s19 + $0x40] sm:$0xf] }
  0x2f   : > { %1766 = vrot.lane.b32.xlu0 %v1585_v50, %s3265_s26  ;;  %v1092_v34 = vor.u32 %v1091_v21, %v1087_v18  ;;  %v1096_v35 = vrot.slane %v1094_v22, 1  ;;  %v1343_v38 = vrot.slane %v2907_v26, 1  ;;  %v1344_v39 = vrot.slane %v3422_v0, 1  ;;  %v230_v50 = vld [vmem:[%s3311_s19 + $0x3c] sm:$0xf] }
  0x30   : > { %v1340_v40 = vrot.slane %v2906_v27, 1  ;;  %v1341_v41 = vrot.slane %v3117_v9, 1  ;;  %v1613_v42 = vshll.u32 %v2923_v28, 16  ;;  %v1109_v44 = vsel %vm548_vm1, %v1104_v31, %v1108_v32  ;;  %v3127_v6 = vld [vmem:[%s3311_s19 + $0x44] ss:$0 sps:$4 sm:$0x11]  }
  0x31   : > { %745 = vrot.lane.b32.xlu1 %v584_v57, %s3262_s23  ;;  %v1601_v45 = vshll.u32 %v2922_v33, 16  ;;  %v3458_v47 = vcombine.low %v228_v36, %v3447_v37  ;;  %v1097_v49 = vsel %vm548_vm1, %v1092_v34, %v1096_v35  ;;  %v1611_v52 = vshrl.u32 %v2923_v28, 16  ;;  %v2810_v57 = vld [vmem:[%s3311_s19 + $0x30] sm:$0xe]  ;;  %v273_v21 = vld [vmem:[%s3311_s19 + $0x3c] sm:$0xe] }
  0x32   : > { %v1615_v53 = vrot.slane %v1613_v42, 1  ;;  %v1618_v54 = vshll.u32 %v3452_v43, 16  ;;  %v1345_v56 = vsel %vm821_vm0, %v1343_v38, %v1344_v39  ;;  %v3472_v59 = vcombine.low %v230_v50, %v231_v51  ;;  %v2707_v24 = vld [vmem:[%s3311_s19 + $0x4c] sm:$0xf]  ;;  %v2704_v26 = vld [vmem:[%s3311_s19 + $0x3c] sm:$0xf] }
  0x33   : > { %1894 = vrot.lane.b32.xlu0 %v1848_v55, %s3266_s27  ;;  %v3466_v55 = vld [vmem:[%s3311_s19 + $0x38] ss:$0 sps:$4 sm:$0x11]   ;;  %v600_v58 = vshll.u32 %v3458_v47, 16  ;;  %v1599_v60 = vshrl.u32 %v2922_v33, 16  ;;  %v1603_v61 = vrot.slane %v1601_v45, 1  ;;  %v2954_v0 = vcombine.low %v2810_v57, %v2765_v25 }
  0x34   : > { %v1606_v62 = vshll.u32 %v3123_v46, 16  ;;  %v1620_v3 = vrot.slane %v1618_v54, 1  ;;  %v605_v4 = vshll.u32 %v3466_v55, 16  ;;  %v598_v5 = vshrl.u32 %v3458_v47, 16  ;;  %v272_v25 = vld [vmem:[%s3311_s19 + $0x30] sm:$0xe] }
  0x35   : > { %747 = vrot.lane.b32.xlu1 %v596_v2, %s3262_s23  ;;  %v1616_v2 = vor.u32 %v1615_v53, %v1611_v52  ;;  %v612_v7 = vshll.u32 %v3472_v59, 16  ;;  %v1604_v8 = vor.u32 %v1603_v61, %v1599_v60  ;;  %v1852_v13 = vrot.slane %v2954_v0, 1  ;;  %v2705_v27 = vld [vmem:[%s3311_s19 + $0x40] sm:$0xf]  ;;  %v2749_v53 = vld [vmem:[%s3311_s19 + $0x48] sm:$0xe] }
  0x36   : > { %v1608_v9 = vrot.slane %v1606_v62, 1  ;;  %v607_v12 = vrot.slane %v605_v4, 1  ;;  %v610_v18 = vshrl.u32 %v3472_v59, 16  ;;  %v2861_v31 = vcombine.low %v273_v21, %v231_v51  ;;  %v2770_v54 = vld [vmem:[%s3311_s19 + $0x54] sm:$0xf] }
  0x37   : > { %1896 = vrot.lane.b32.xlu0 %v1851_v1, %s3266_s27  ;;  %v602_v1 = vrot.slane %v600_v58, 1  ;;  %v1621_v11 = vsel %vm548_vm1, %v1616_v2, %v1620_v3  ;;  %v614_v19 = vrot.slane %v612_v7, 1  ;;  %v1856_v38 = vrot.slane %v3452_v43, 1  ;;  %v3516_v60 = vld [vmem:[%s3311_s19 + $0x58] sm:$0xf] }
  0x38   : > { %v1609_v22 = vsel %vm548_vm1, %v1604_v8, %v1608_v9  ;;  %v2860_v39 = vcombine.low %v272_v25, %v3447_v37  ;;  %v837_v42 = vrot.slane %v2861_v31, 1  ;;  %v835_v50 = vrot.slane %v3466_v55, 1  ;;  %v2748_v61 = vld [vmem:[%s3311_s19 + $0x3c] sm:$0xe]  ;;  %v2768_v0 = vld [vmem:[%s3311_s19 + $0x48] sm:$0xf] }
  0x39   : > { %876 = vrot.lane.b32.xlu1 %v833_v14, %s3261_s22  ;;  %v1853_v14 = vrot.slane %v3123_v46, 1  ;;  %v603_v15 = vor.u32 %v602_v1, %v598_v5  ;;  %v3522_v2 = vld [vmem:[%s3311_s19 + $0x4c] sm:$0xf]  ;;  %v2909_v3 = vcombine.low %v2749_v53, %v2707_v24  ;;  %v2925_v4 = vcombine.low %v2770_v54, %v3516_v60  ;;  %v234_v25 = vld [vmem:[%s3311_s19 + $0x54] sm:$0xf] }
  0x3a   : > { %v834_v37 = vrot.slane %v2860_v39, 1  ;;  %v2908_v5 = vcombine.low %v2748_v61, %v2705_v27  ;;  %v2924_v9 = vcombine.low %v2768_v0, %v3522_v2  ;;  %v275_v61 = vld [vmem:[%s3311_s19 + $0x54] sm:$0xe] }
  0x3b   : > { %874 = vrot.lane.b32.xlu0 %v830_v17, %s3261_s22  ;;  %v617_v17 = vshll.u32 %v3127_v6, 16  ;;  %v608_v32 = vsel %vm548_vm1, %v603_v15, %v607_v12  ;;  %v1854_v36 = vsel %vm821_vm0, %v1852_v13, %v1853_v14  ;;  %v1349_v12 = vrot.slane %v2909_v3, 1  ;;  %v3535_v15 = vld [vmem:[%s3311_s19 + $0x5c] ss:$0 sps:$4 sm:$0x11]  }
  0x3c   : > { %v836_v55 = vsel %vm821_vm0, %v834_v37, %v835_v50  ;;  %v1637_v14 = vshll.u32 %v2925_v4, 16  ;;  %v1642_v31 = vshll.u32 %v3535_v15, 16  ;;  %v1623_v39 = vshrl.u32 %v2924_v9, 16 }
  0x3d   : > { %988 = vrot.lane.b32.xlu1 %v2875_v48, %s3259_s20  ;;  %v1342_v48 = vsel %vm821_vm0, %v1340_v40, %v1341_v41  ;;  %v619_v34 = vrot.slane %v617_v17, 1  ;;  %v2876_v40 = vcombine.low %v2704_v26, %v2705_v27  ;;  %v3501_v41 = vld [vmem:[%s3311_s19 + $0x50] ss:$0 sps:$4 sm:$0x11]   ;;  %v3548_v26 = vld [vmem:[%s3311_s19 + $0x58] sm:$0xf] }
  0x3e   : > { %v1130_v58 = vshll.u32 %v3501_v41, 16  ;;  %v1350_v13 = vrot.slane %v3501_v41, 1  ;;  %v3540_v17 = vld [vmem:[%s3311_s19 + $0x50] ss:$0 sps:$4 sm:$0x11]   ;;  %v1635_v27 = vshrl.u32 %v2925_v4, 16 }
  0x3f   : > { %986 = vrot.lane.b32.xlu0 %v2874_v63, %s3259_s20  ;;  %v2811_v63 = vld [vmem:[%s3311_s19 + $0x3c] sm:$0xe]  ;;  %v1113_v51 = vshll.u32 %v2876_v40, 16  ;;  %v1111_v62 = vshrl.u32 %v2876_v40, 16  ;;  %v1630_v41 = vshll.u32 %v3540_v17, 16 }
  0x40   : > { %v2955_v10 = vcombine.low %v2811_v63, %v3437_v20  ;;  %v2706_v20 = vld [vmem:[%s3311_s19 + $0x48] sm:$0xf] }
  0x41   : > { %1260 = vrot.lane.b32.xlu1 %v1109_v44, %s3263_s24  ;;  %v2877_v35 = vcombine.low %v2706_v20, %v2707_v24  ;;  %v838_v44 = vrot.slane %v3127_v6, 1  ;;  %v1115_v63 = vrot.slane %v1113_v51, 1  ;;  %v1132_v6 = vrot.slane %v1130_v58, 1  ;;  %v3174_v58 = vld [vmem:[%s4423_s1] sm:$0xff]  }
  0x42   : > { %v1625_v24 = vshll.u32 %v2924_v9, 16 }
  0x43   : > { %1258 = vrot.lane.b32.xlu0 %v1097_v49, %s3263_s24  ;;  %v1125_v46 = vshll.u32 %v2877_v35, 16  ;;  %v3135_v49 = vld [vmem:[%s3311_s19 + $0x44] ss:$0 sps:$4 sm:$0x11]   ;;  %v839_v52 = vsel %vm821_vm0, %v837_v42, %v838_v44  ;;  %v1116_v8 = vor.u32 %v1115_v63, %v1111_v62  ;;  %v2812_v42 = vld [vmem:[%s3311_s19 + $0x48] sm:$0xe] }
  0x44   : > { %v1347_v20 = vrot.slane %v3135_v49, 1  ;;  %v3171_v44 = vld [vmem:[%s4423_s1 + $0x8] sm:$0xff]   ;;  %v2956_v53 = vcombine.low %v2812_v42, %v3522_v2  ;;  %v2710_v62 = vld [vmem:[%s3311_s19 + $0x60] sm:$0xf] }
  0x45   : > { %1388 = vrot.lane.b32.xlu1 %v1345_v56, %s3260_s21  ;;  %v1123_v56 = vshrl.u32 %v2877_v35, 16  ;;  %v1127_v57 = vrot.slane %v1125_v46, 1  ;;  %v1644_v46 = vrot.slane %v1642_v31, 1  ;;  %v3152_v31 = vld [vmem:[%s3311_s19 + $0x68] ss:$0 sps:$4 sm:$0x11]  }
  0x46   : > { %v1154_v42 = vshll.u32 %v3152_v31, 16 }
  0x47   : > { %1386 = vrot.lane.b32.xlu0 %v1342_v48, %s3260_s21  ;;  %v1118_v48 = vshll.u32 %v3135_v49, 16  ;;  %v1128_v1 = vor.u32 %v1127_v57, %v1123_v56  ;;  %v1632_v56 = vrot.slane %v1630_v41, 1  ;;  %v2813_v57 = vld [vmem:[%s3311_s19 + $0x54] sm:$0xe] }
  0x49   : > { %1500 = vrot.lane.b32.xlu1 %v2923_v28, %s3264_s25  ;;  %v1855_v28 = vrot.slane %v2955_v10, 1  ;;  %v1120_v7 = vrot.slane %v1118_v48, 1  ;;  %v232_v10 = vld [vmem:[%s3311_s19 + $0x48] sm:$0xf] }
  0x4b   : > { %1498 = vrot.lane.b32.xlu0 %v2922_v33, %s3264_s25  ;;  %v615_v33 = vor.u32 %v614_v19, %v610_v18  ;;  %v1857_v43 = vsel %vm821_vm0, %v1855_v28, %v1856_v38  ;;  %v1133_v18 = vsel %vm548_vm1, %v1128_v1, %v1132_v6  ;;  %v1346_v19 = vrot.slane %v2908_v5, 1  ;;  %v3591_v5 = vld [vmem:[%s3311_s19 + $0x64] sm:$0xf] }
  0x4c   : > { %v1639_v28 = vrot.slane %v1637_v14, 1  ;;  %v1858_v6 = vrot.slane %v2956_v53, 1 }
  0x4d   : > { %1772 = vrot.lane.b32.xlu1 %v1621_v11, %s3265_s26  ;;  %v620_v45 = vsel %vm548_vm1, %v615_v33, %v619_v34  ;;  %v3530_v11 = vld [vmem:[%s3311_s19 + $0x4c] sm:$0xf]  ;;  %v1351_v33 = vsel %vm821_vm0, %v1349_v12, %v1350_v13  ;;  %v1348_v38 = vsel %vm821_vm0, %v1346_v19, %v1347_v20  ;;  %v2709_v12 = vld [vmem:[%s3311_s19 + $0x58] sm:$0xf]  ;;  %v2879_v13 = vcombine.low %v2710_v62, %v3591_v5  ;;  %v3636_v62 = vld [vmem:[%s3311_s19 + $0x64] sm:$0xf] }
  0x4e   : > { %v3543_v21 = vcombine.low %v232_v10, %v3530_v11  ;;  %v2708_v10 = vld [vmem:[%s3311_s19 + $0x54] sm:$0xf]  ;;  %v1862_v20 = vrot.slane %v3535_v15, 1 }
  0x4f   : > { %1770 = vrot.lane.b32.xlu0 %v1609_v22, %s3265_s26  ;;  %v1121_v22 = vsel %vm548_vm1, %v1116_v8, %v1120_v7  ;;  %v1859_v7 = vrot.slane %v3540_v17, 1  ;;  %v274_v8 = vld [vmem:[%s3311_s19 + $0x48] sm:$0xe] }
  0x50   : > { %v624_v34 = vshll.u32 %v3543_v21, 16  ;;  %v622_v37 = vshrl.u32 %v3543_v21, 16  ;;  %v2862_v19 = vcombine.low %v274_v8, %v3530_v11 }
  0x51   : > { %749 = vrot.lane.b32.xlu1 %v608_v32, %s3262_s23  ;;  %v3553_v32 = vld [vmem:[%s3311_s19 + $0x50] ss:$0 sps:$4 sm:$0x11]   ;;  %v1860_v17 = vsel %vm821_vm0, %v1858_v6, %v1859_v7  ;;  %v3645_v7 = vld [vmem:[%s3311_s19 + $0x68] ss:$0 sps:$4 sm:$0x11]  }
  0x52   : > { %v629_v49 = vshll.u32 %v3553_v32, 16  ;;  %v626_v50 = vrot.slane %v624_v34, 1  ;;  %v840_v15 = vrot.slane %v2862_v19, 1 }
  0x53   : > { %1898 = vrot.lane.b32.xlu0 %v1854_v36, %s3266_s27  ;;  %v3166_v36 = vld [vmem:[%s4423_s1 + $0x10] ss:$0 sps:$4 sm:$0x33]  }
  0x54   : > { %3053 = vmatprep.subr.msk.bf16.mxu0 %vm2243_vm2, %v3166_v36  ;;  %3054 = vmatprep.subr.msk.bf16.mxu1 %vm2243_vm2, %v3166_v36  ;;  %v627_v63 = vor.u32 %v626_v50, %v622_v37  ;;  %v2772_v50 = vld [vmem:[%s3311_s19 + $0x60] sm:$0xf] }
  0x55   : > { %751 = vrot.lane.b32.xlu1 %v620_v45, %s3262_s23  ;;  %v1640_v45 = vor.u32 %v1639_v28, %v1635_v27 }
  0x57   : > { %1900 = vrot.lane.b32.xlu0 %v1857_v43, %s3266_s27  ;;  %v3573_v43 = vld [vmem:[%s3311_s19 + $0x5c] ss:$0 sps:$4 sm:$0x11]   ;;  %v1645_v48 = vsel %vm548_vm1, %v1640_v45, %v1644_v46  ;;  %v2774_v45 = vld [vmem:[%s3311_s19 + $0x6c] sm:$0xf] }
  0x58   : > { %v641_v3 = vshll.u32 %v3573_v43, 16  ;;  %v844_v28 = vrot.slane %v3573_v43, 1  ;;  %v3622_v46 = vld [vmem:[%s3311_s19 + $0x70] sm:$0xf] }
  0x59   : > { %880 = vrot.lane.b32.xlu1 %v839_v52, %s3261_s22  ;;  %v2245_v52 = vsel %vm2243_vm2, %v3166_v36, 0  ;;  %v3153_v36 = vld [vmem:[%s3311_s19 + $0x5c] ss:$0 sps:$4 sm:$0x11]  }
  0x5a   : > { %3010 = vmatpush3.bf16.msra.mxu0 %v2245_v52  ;;  %3050 = vmatpush3.bf16.msra.mxu1 %v2245_v52  ;;  %v1142_v37 = vshll.u32 %v3153_v36, 16 }
  0x5b   : > { %878 = vrot.lane.b32.xlu0 %v836_v55, %s3261_s22  ;;  %3011 = vmatprep.subr.bf16.mxu0 %v3171_v44  ;;  %v631_v55 = vrot.slane %v629_v49, 1 }
  0x5c   : > { %3048 = vmatprep.subr.bf16.mxu1 %v3171_v44 }
  0x5d   : > { %992 = vrot.lane.b32.xlu1 %v2877_v35, %s3259_s20  ;;  %v3559_v35 = vcombine.low %v234_v25, %v3548_v26  ;;  %v841_v25 = vrot.slane %v3553_v32, 1  ;;  %v2751_v32 = vld [vmem:[%s3311_s19 + $0x60] sm:$0xe] }
  0x5e   : > { %3012 = vmatpush3.bf16.msra.mxu0 %v3171_v44  ;;  %3051 = vmatpush3.bf16.msra.mxu1 %v3171_v44  ;;  %v2911_v52 = vcombine.low %v2751_v32, %v3591_v5  ;;  %v3640_v5 = vld [vmem:[%s3311_s19 + $0x74] ss:$0 sps:$4 sm:$0x11]  }
  0x5f   : > { %990 = vrot.lane.b32.xlu0 %v2876_v40, %s3259_s20  ;;  %v1627_v40 = vrot.slane %v1625_v24, 1  ;;  %v636_v51 = vshll.u32 %v3559_v35, 16  ;;  %v634_v0 = vshrl.u32 %v3559_v35, 16  ;;  %3013 = vmatprep.subr.bf16.mxu0 %v3174_v58  ;;  %v2878_v24 = vcombine.low %v2708_v10, %v2709_v12 }
  0x60   : > { %3049 = vmatprep.subr.bf16.mxu1 %v3174_v58  ;;  %v842_v49 = vsel %vm821_vm0, %v840_v15, %v841_v25 }
  0x61   : > { %1264 = vrot.lane.b32.xlu1 %v1133_v18, %s3263_s24  ;;  %v1628_v54 = vor.u32 %v1627_v40, %v1623_v39  ;;  %v638_v2 = vrot.slane %v636_v51, 1  ;;  %v643_v18 = vrot.slane %v641_v3, 1  ;;  %v1137_v34 = vshll.u32 %v2878_v24, 16  ;;  %v3627_v51 = vld [vmem:[%s3311_s19 + $0x64] sm:$0xf] }
  0x62   : > { %3014 = vmatpush3.bf16.msra.mxu0 %v3174_v58  ;;  %3052 = vmatpush3.bf16.msra.mxu1 %v3174_v58  ;;  %v1147_v39 = vshrl.u32 %v2879_v13, 16  ;;  %v1135_v44 = vshrl.u32 %v2878_v24, 16  ;;  %v2926_v58 = vcombine.low %v2772_v50, %v3627_v51 }
  0x63   : > { %1262 = vrot.lane.b32.xlu0 %v1121_v22, %s3263_s24  ;;  %v1633_v1 = vsel %vm548_vm1, %v1628_v54, %v1632_v56  ;;  %v639_v14 = vor.u32 %v638_v2, %v634_v0  ;;  %v1139_v43 = vrot.slane %v1137_v34, 1  ;;  %v2927_v54 = vcombine.low %v2774_v45, %v3622_v46  ;;  %v3676_v34 = vld [vmem:[%s3311_s19 + $0x74] ss:$0 sps:$4 sm:$0x11]  }
  0x64   : > { %v1356_v0 = vrot.slane %v3152_v31, 1  ;;  %v1649_v6 = vshll.u32 %v2926_v58, 16 }
  0x65   : > { %1392 = vrot.lane.b32.xlu1 %v1351_v33, %s3260_s21  ;;  %v644_v11 = vsel %vm548_vm1, %v639_v14, %v643_v18  ;;  %v1661_v3 = vshll.u32 %v2927_v54, 16  ;;  %v1666_v14 = vshll.u32 %v3640_v5, 16  ;;  %v3658_v18 = vld [vmem:[%s3311_s19 + $0x68] ss:$0 sps:$4 sm:$0x11]  }
  0x66   : > { %v1651_v25 = vrot.slane %v1649_v6, 1 }
  0x67   : > { %1390 = vrot.lane.b32.xlu0 %v1348_v38, %s3260_s21  ;;  %v2750_v38 = vld [vmem:[%s3311_s19 + $0x54] sm:$0xe]  ;;  %v1668_v31 = vrot.slane %v1666_v14, 1  ;;  %v850_v14 = vrot.slane %v3676_v34, 1 }
  0x68   : > { %v2910_v53 = vcombine.low %v2750_v38, %v2709_v12  ;;  %v238_v12 = vld [vmem:[%s3311_s19 + $0x6c] sm:$0xf] }
  0x69   : > { %1504 = vrot.lane.b32.xlu1 %v2925_v4, %s3264_s25  ;;  %v2957_v4 = vcombine.low %v2813_v57, %v3516_v60  ;;  %v632_v60 = vsel %vm548_vm1, %v627_v63, %v631_v55  ;;  %v1156_v57 = vrot.slane %v1154_v42, 1  ;;  %v1144_v55 = vrot.slane %v1142_v37, 1  ;;  %v2815_v42 = vld [vmem:[%s3311_s19 + $0x6c] sm:$0xe] }
  0x6a   : > { %v1355_v63 = vrot.slane %v2911_v52, 1  ;;  %v1352_v2 = vrot.slane %v2910_v53, 1  ;;  %v665_v52 = vshll.u32 %v3676_v34, 16  ;;  %v276_v53 = vld [vmem:[%s3311_s19 + $0x60] sm:$0xe] }
  0x6b   : > { %1502 = vrot.lane.b32.xlu0 %v2924_v9, %s3264_s25  ;;  %v2863_v9 = vcombine.low %v275_v61, %v3548_v26  ;;  %v1861_v22 = vrot.slane %v2957_v4, 1  ;;  %v1149_v26 = vshll.u32 %v2879_v13, 16  ;;  %v236_v61 = vld [vmem:[%s3311_s19 + $0x60] sm:$0xf] }
  0x6c   : > { %v3648_v8 = vcombine.low %v236_v61, %v3636_v62  ;;  %v1357_v19 = vsel %vm821_vm0, %v1355_v63, %v1356_v0  ;;  %v2714_v61 = vld [vmem:[%s3311_s19 + $0x78] sm:$0xf]  ;;  %v2712_v63 = vld [vmem:[%s3311_s19 + $0x6c] sm:$0xf]  ;;  %v3703_v0 = vld [vmem:[%s3311_s19 + $0x70] sm:$0xf] }
  0x6d   : > { %1776 = vrot.lane.b32.xlu1 %v1645_v48, %s3265_s26  ;;  %v843_v27 = vrot.slane %v2863_v9, 1  ;;  %v1863_v33 = vsel %vm821_vm0, %v1861_v22, %v1862_v20  ;;  %v1151_v40 = vrot.slane %v1149_v26, 1  ;;  %v1140_v48 = vor.u32 %v1139_v43, %v1135_v44  ;;  %v3653_v9 = vld [vmem:[%s3311_s19 + $0x70] sm:$0xf] }
  0x6e   : > { %v3664_v22 = vcombine.low %v238_v12, %v3653_v9  ;;  %v1654_v26 = vshll.u32 %v3645_v7, 16 }
  0x6f   : > { %1774 = vrot.lane.b32.xlu0 %v1633_v1, %s3265_s26  ;;  %v845_v41 = vsel %vm821_vm0, %v843_v27, %v844_v28  ;;  %v1152_v56 = vor.u32 %v1151_v40, %v1147_v39  ;;  %v1353_v1 = vrot.slane %v3153_v36, 1  ;;  %v1145_v10 = vsel %vm548_vm1, %v1140_v48, %v1144_v55 }
  0x70   : > { %v646_v36 = vshrl.u32 %v3648_v8, 16  ;;  %v660_v38 = vshll.u32 %v3664_v22, 16  ;;  %v658_v50 = vshrl.u32 %v3664_v22, 16  ;;  %v1865_v55 = vrot.slane %v3645_v7, 1 }
  0x71   : > { %753 = vrot.lane.b32.xlu1 %v632_v60, %s3262_s23  ;;  %v1157_v4 = vsel %vm548_vm1, %v1152_v56, %v1156_v57  ;;  %v1663_v60 = vrot.slane %v1661_v3, 1  ;;  %v1354_v20 = vsel %vm821_vm0, %v1352_v2, %v1353_v1  ;;  %v2864_v3 = vcombine.low %v276_v53, %v3636_v62  ;;  %v3757_v53 = vld [vmem:[%s3311_s19 + $0x7c] sm:$0xf] }
  0x72   : > { %v667_v1 = vrot.slane %v665_v52, 1  ;;  %v3718_v62 = vcombine.low %v2712_v63, %v3703_v0  ;;  %v2776_v52 = vld [vmem:[%s3311_s19 + $0x78] sm:$0xf] }
  0x73   : > { %1902 = vrot.lane.b32.xlu0 %v1860_v17, %s3266_s27  ;;  %v648_v17 = vshll.u32 %v3648_v8, 16 }
  0x75   : > { %755 = vrot.lane.b32.xlu1 %v644_v11, %s3262_s23  ;;  %v2814_v11 = vld [vmem:[%s3311_s19 + $0x60] sm:$0xe]  ;;  %v650_v32 = vrot.slane %v648_v17, 1  ;;  %v847_v17 = vrot.slane %v3658_v18, 1 }
  0x76   : > { %v2958_v39 = vcombine.low %v2814_v11, %v3627_v51  ;;  %v662_v51 = vrot.slane %v660_v38, 1  ;;  %v1161_v11 = vshll.u32 %v3718_v62, 16 }
  0x77   : > { %1904 = vrot.lane.b32.xlu0 %v1863_v33, %s3266_s27  ;;  %v653_v33 = vshll.u32 %v3658_v18, 16  ;;  %v651_v37 = vor.u32 %v650_v32, %v646_v36  ;;  %v2753_v18 = vld [vmem:[%s3311_s19 + $0x78] sm:$0xe] }
  0x78   : > { %v1864_v48 = vrot.slane %v2958_v39, 1  ;;  %v2778_v39 = vld [vmem:[%s3311_s19 + $0x84] sm:$0xf] }
  0x79   : > { %884 = vrot.lane.b32.xlu1 %v845_v41, %s3261_s22  ;;  %v1656_v41 = vrot.slane %v1654_v26, 1  ;;  %v655_v45 = vrot.slane %v653_v33, 1  ;;  %v2752_v33 = vld [vmem:[%s3311_s19 + $0x6c] sm:$0xe] }
  0x7b   : > { %882 = vrot.lane.b32.xlu0 %v842_v49, %s3261_s22  ;;  %v277_v49 = vld [vmem:[%s3311_s19 + $0x6c] sm:$0xe] }
  0x7c   : > { %v2865_v2 = vcombine.low %v277_v49, %v3653_v9  ;;  %v1868_v9 = vrot.slane %v3640_v5, 1 }
  0x7d   : > { %996 = vrot.lane.b32.xlu1 %v2879_v13, %s3259_s20  ;;  %v1659_v13 = vshrl.u32 %v2927_v54, 16 }
  0x7f   : > { %994 = vrot.lane.b32.xlu0 %v2878_v24, %s3259_s20  ;;  %v1647_v24 = vshrl.u32 %v2926_v58, 16  ;;  %v1664_v15 = vor.u32 %v1663_v60, %v1659_v13  ;;  %v849_v60 = vrot.slane %v2865_v2, 1  ;;  %v3772_v2 = vcombine.low %v2776_v52, %v3757_v53  ;;  %v2817_v52 = vld [vmem:[%s3311_s19 + $0x84] sm:$0xe] }
  0x81   : > { %1268 = vrot.lane.b32.xlu1 %v1157_v4, %s3263_s24  ;;  %v1652_v40 = vor.u32 %v1651_v25, %v1647_v24  ;;  %v1669_v44 = vsel %vm548_vm1, %v1664_v15, %v1668_v31  ;;  %v663_v4 = vor.u32 %v662_v51, %v658_v50  ;;  %v3727_v24 = vld [vmem:[%s3311_s19 + $0x80] ss:$0 sps:$4 sm:$0x11]   ;;  %v3734_v15 = vld [vmem:[%s3311_s19 + $0x74] ss:$0 sps:$4 sm:$0x11]   ;;  %v851_v36 = vsel %vm821_vm0, %v849_v60, %v850_v14 }
  0x82   : > { %v1178_v38 = vshll.u32 %v3727_v24, 16  ;;  %v1166_v49 = vshll.u32 %v3734_v15, 16  ;;  %v3789_v60 = vld [vmem:[%s3311_s19 + $0x80] ss:$0 sps:$4 sm:$0x11]  }
  0x83   : > { %1266 = vrot.lane.b32.xlu0 %v1145_v10, %s3263_s24  ;;  %v1657_v57 = vsel %vm548_vm1, %v1652_v40, %v1656_v41  ;;  %v1866_v10 = vsel %vm821_vm0, %v1864_v48, %v1865_v55  ;;  %v3745_v40 = vld [vmem:[%s3311_s19 + $0x88] sm:$0xf] }
  0x84   : > { %v1180_v55 = vrot.slane %v1178_v38, 1 }
  0x85   : > { %1396 = vrot.lane.b32.xlu1 %v1357_v19, %s3260_s21  ;;  %v3670_v27 = vpop.permute.xlu1 %984  ;;  %v846_v19 = vrot.slane %v2864_v3, 1  ;;  %v240_v3 = vld [vmem:[%s3311_s19 + $0x78] sm:$0xf] }
  0x86   : > { %v3672_v28 = vpop.permute.xlu0 %982 }
  0x87   : > { %1394 = vrot.lane.b32.xlu0 %v1354_v20, %s3260_s21  ;;  %v668_v20 = vsel %vm548_vm1, %v663_v4, %v667_v1  ;;  %v1362_v1 = vrot.slane %v3727_v24, 1  ;;  %v242_v24 = vld [vmem:[%s3311_s19 + $0x84] sm:$0xf] }
  0x89   : > { %1508 = vrot.lane.b32.xlu1 %v2927_v54, %s3264_s25  ;;  %v2959_v54 = vcombine.low %v2815_v42, %v3622_v46  ;;  %v656_v46 = vsel %vm548_vm1, %v651_v37, %v655_v45  ;;  %v848_v42 = vsel %vm821_vm0, %v846_v19, %v847_v17  ;;  %v1163_v45 = vrot.slane %v1161_v11, 1 }
  0x8a   : > { %v3687_v43 = vpop.permute.xlu0 %1382 }
  0x8b   : > { %1506 = vrot.lane.b32.xlu0 %v2926_v58, %s3264_s25  ;;  %v3693_v56 = vpop.permute.xlu1 %870  ;;  %v3699_v58 = vld [vmem:[%s3311_s19 + $0x7c] sm:$0xf]  ;;  %v1867_v12 = vrot.slane %v2959_v54, 1  ;;  %v2912_v54 = vcombine.low %v2752_v33, %v3703_v0  ;;  %v1168_v0 = vrot.slane %v1166_v49, 1 }
  0x8c   : > { %v3711_v6 = vcombine.low %v2714_v61, %v3699_v58  ;;  %v2913_v51 = vcombine.low %v2753_v18, %v3699_v58 }
  0x8d   : > { %1780 = vrot.lane.b32.xlu1 %v1669_v44, %s3265_s26  ;;  %v1869_v26 = vsel %vm821_vm0, %v1867_v12, %v1868_v9  ;;  %v1159_v44 = vshrl.u32 %v3718_v62, 16  ;;  %v1358_v12 = vrot.slane %v2912_v54, 1  ;;  %v1359_v9 = vrot.slane %v3734_v15, 1 }
  0x8e   : > { %v1173_v5 = vshll.u32 %v3711_v6, 16  ;;  %v1171_v34 = vshrl.u32 %v3711_v6, 16  ;;  %v1361_v4 = vrot.slane %v2913_v51, 1 }
  0x8f   : > { %1778 = vrot.lane.b32.xlu0 %v1657_v57, %s3265_s26  ;;  %v3713_v7 = vpop.permute.xlu1 %872  ;;  %v3762_v57 = vcombine.low %v2778_v39, %v3745_v40  ;;  %v1164_v63 = vor.u32 %v1163_v45, %v1159_v44  ;;  %v1360_v15 = vsel %vm821_vm0, %v1358_v12, %v1359_v9 }
  0x90   : > { %v1175_v32 = vrot.slane %v1173_v5, 1  ;;  %v1673_v5 = vshll.u32 %v3772_v2, 16  ;;  %v1363_v11 = vsel %vm821_vm0, %v1361_v4, %v1362_v1 }
  0x91   : > { %v742_v13 = vpop.permute.xlu0 %741  ;;  %757 = vrot.lane.b32.xlu1 %v656_v46, %s3262_s23  ;;  %v3776_v46 = vld [vmem:[%s3311_s19 + $0x7c] sm:$0xf] }
  0x92   : > { %v1928_v37 = vsel %vm1926_vm3, %v3339_v23, %v742_v13  ;;  %v1176_v23 = vor.u32 %v1175_v32, %v1171_v34  ;;  %v1685_v13 = vshll.u32 %v3762_v57, 16  ;;  %v3797_v19 = vcombine.low %v240_v3, %v3776_v46  ;;  %v3814_v34 = vld [vmem:[%s3311_s19 + $0x80] ss:$0 sps:$4 sm:$0x11]  }
  0x93   : > { %1906 = vrot.lane.b32.xlu0 %v1866_v10, %s3266_s27  ;;  %v3729_v25 = vpop.permute.xlu1 %1384  ;;  %v1961_v61 = vsel %vm1959_vm4, %v1928_v37, %v3693_v56  ;;  %v3780_v10 = vld [vmem:[%s3311_s19 + $0x8c] ss:$0 sps:$4 sm:$0x11]   ;;  %v1675_v45 = vrot.slane %v1673_v5, 1 }
  0x94   : > { %v1994_v14 = vsel %vm1992_vm5, %v1961_v61, %v3672_v28  ;;  %v3804_v28 = vld [vmem:[%s3311_s19 + $0x88] sm:$0xf]  ;;  %v1687_v18 = vrot.slane %v1685_v13, 1  ;;  %v1690_v33 = vshll.u32 %v3780_v10, 16  ;;  %v672_v32 = vshll.u32 %v3797_v19, 16 }
  0x95   : > { %v744_v31 = vpop.permute.xlu0 %743  ;;  %759 = vrot.lane.b32.xlu1 %v668_v20, %s3262_s23  ;;  %v1169_v20 = vsel %vm548_vm1, %v1164_v63, %v1168_v0  ;;  %v3822_v38 = vcombine.low %v242_v24, %v3804_v28  ;;  %v3842_v63 = vld [vmem:[%s3311_s19 + $0x8c] ss:$0 sps:$4 sm:$0x11]   ;;  %v2961_v13 = vcombine.low %v2817_v52, %v3745_v40  ;;  %v1871_v24 = vrot.slane %v3789_v60, 1  ;;  %v2755_v52 = vld [vmem:[%s3311_s19 + $0x90] sm:$0xe] }
  0x96   : > { %v1930_v48 = vsel %vm1926_vm3, %v3344_v29, %v744_v31  ;;  %v1683_v31 = vshrl.u32 %v3762_v57, 16  ;;  %v674_v61 = vrot.slane %v672_v32, 1  ;;  %v689_v40 = vshll.u32 %v3842_v63, 16 }
  0x97   : > { %1908 = vrot.lane.b32.xlu0 %v1869_v26, %s3266_s27  ;;  %v3747_v41 = vpop.permute.xlu1 %1256  ;;  %v1963_v56 = vsel %vm1959_vm4, %v1930_v48, %v3713_v7  ;;  %v1181_v7 = vsel %vm548_vm1, %v1176_v23, %v1180_v55  ;;  %v1692_v48 = vrot.slane %v1690_v33, 1  ;;  %v670_v55 = vshrl.u32 %v3797_v19, 16 }
  0x98   : > { %v1688_v54 = vor.u32 %v1687_v18, %v1683_v31  ;;  %v684_v0 = vshll.u32 %v3822_v38, 16  ;;  %v3873_v31 = vld [vmem:[%s3311_s19 + $0x88] sm:$0xf]  ;;  %v1873_v18 = vrot.slane %v2961_v13, 1 }
  0x99   : > { %v1255_v50 = vpop.permute.xlu0 %1254  ;;  %888 = vrot.lane.b32.xlu1 %v851_v36, %s3261_s22  ;;  %v1671_v36 = vshrl.u32 %v3772_v2, 16 }
  0x9b   : > { %886 = vrot.lane.b32.xlu0 %v848_v42, %s3261_s22  ;;  %v3769_v58 = vpop.permute.xlu1 %1496 }
  0x9d   : > { %v1495_v29 = vpop.permute.xlu0 %1494  ;;  %1000 = vrot.lane.b32.xlu1 %v3711_v6, %s3259_s20  ;;  %v2027_v6 = vsel %vm2025_vm6, %v1994_v14, %v1255_v50  ;;  %v2816_v50 = vld [vmem:[%s3311_s19 + $0x78] sm:$0xe] }
  0x9e   : > { %v2960_v4 = vcombine.low %v2816_v50, %v3757_v53  ;;  %v675_v53 = vor.u32 %v674_v61, %v670_v55  ;;  %v856_v50 = vrot.slane %v3842_v63, 1  ;;  %v3192_v61 = vld [vmem:[%s3311_s19 + $0x8c] ss:$0 sps:$4 sm:$0x11]  }
  0x9f   : > { %998 = vrot.lane.b32.xlu0 %v3718_v62, %s3259_s20  ;;  %v1769_v17 = vpop.permute.xlu1 %1768  ;;  %v1996_v62 = vsel %vm1992_vm5, %v1963_v56, %v3670_v27  ;;  %v2060_v27 = vsel %vm2058_vm7, %v2027_v6, %v3687_v43  ;;  %v1678_v43 = vshll.u32 %v3789_v60, 16  ;;  %v686_v6 = vrot.slane %v684_v0, 1 }
  0xa0   : > { %v2029_v39 = vsel %vm2025_vm6, %v1996_v62, %v3747_v41  ;;  %v2093_v42 = vsel %vm2091_vm8, %v2060_v27, %v1495_v29  ;;  %v677_v41 = vshll.u32 %v3814_v34, 16  ;;  %v1870_v5 = vrot.slane %v2960_v4, 1  ;;  %v2718_v62 = vld [vmem:[%s3311_s19 + $0x90] sm:$0xf]  ;;  %v2782_v4 = vld [vmem:[%s3311_s19 + $0x9c] sm:$0xf] }
  0xa1   : > { %v1767_v26 = vpop.permute.xlu0 %1766  ;;  %1272 = vrot.lane.b32.xlu1 %v1181_v7, %s3263_s24  ;;  %v2062_v23 = vsel %vm2058_vm7, %v2029_v39, %v3729_v25  ;;  %v1676_v25 = vor.u32 %v1675_v45, %v1671_v36  ;;  %v1680_v1 = vrot.slane %v1678_v43, 1  ;;  %v682_v7 = vshrl.u32 %v3822_v38, 16 }
  0xa2   : > { %v2126_v49 = vsel %vm2124_vm9, %v2093_v42, %v1767_v26  ;;  %v2095_v3 = vsel %vm2091_vm8, %v2062_v23, %v3769_v58  ;;  %v1693_v58 = vsel %vm548_vm1, %v1688_v54, %v1692_v48  ;;  %v679_v14 = vrot.slane %v677_v41, 1  ;;  %v2719_v26 = vld [vmem:[%s3311_s19 + $0x94] sm:$0xf]  ;;  %v3191_v54 = vld [vmem:[%s3311_s19 + $0x98] ss:$0 sps:$4 sm:$0x11]  }
  0xa3   : > { %1270 = vrot.lane.b32.xlu0 %v1169_v20, %s3263_s24  ;;  %v3827_v44 = vpop.permute.xlu1 %745  ;;  %v2128_v56 = vsel %vm2124_vm9, %v2095_v3, %v1769_v17  ;;  %v279_v17 = vld [vmem:[%s3311_s19 + $0x84] sm:$0xe]  ;;  %v687_v36 = vor.u32 %v686_v6, %v682_v7  ;;  %v691_v60 = vrot.slane %v689_v40, 1  ;;  %v2883_v32 = vcombine.low %v2718_v62, %v2719_v26  ;;  %v2780_v40 = vld [vmem:[%s3311_s19 + $0x90] sm:$0xf] }
  0xa4   : > { %v2867_v33 = vcombine.low %v279_v17, %v3804_v28  ;;  %v680_v27 = vsel %vm548_vm1, %v675_v53, %v679_v14  ;;  %v1872_v42 = vsel %vm821_vm0, %v1870_v5, %v1871_v24  ;;  %v1874_v45 = vrot.slane %v3780_v10, 1  ;;  %v2754_v3 = vld [vmem:[%s3311_s19 + $0x84] sm:$0xe]  ;;  %v3912_v17 = vld [vmem:[%s3311_s19 + $0x94] sm:$0xf] }
  0xa5   : > { %v1895_v37 = vpop.permute.xlu0 %1894  ;;  %1400 = vrot.lane.b32.xlu1 %v1363_v11, %s3260_s21  ;;  %v278_v11 = vld [vmem:[%s3311_s19 + $0x78] sm:$0xe]  ;;  %v1197_v10 = vshll.u32 %v2883_v32, 16  ;;  %v853_v23 = vrot.slane %v3814_v34, 1  ;;  %v1190_v53 = vshll.u32 %v3192_v61, 16  ;;  %v2914_v6 = vcombine.low %v2754_v3, %v3873_v31 }
  0xa6   : > { %v2159_v51 = vsel %vm2157_vm10, %v2126_v49, %v1895_v37  ;;  %v2866_v43 = vcombine.low %v278_v11, %v3776_v46  ;;  %v855_v37 = vrot.slane %v2867_v33, 1  ;;  %v1875_v48 = vsel %vm821_vm0, %v1873_v18, %v1874_v45  ;;  %v244_v18 = vld [vmem:[%s3311_s19 + $0x90] sm:$0xf]  ;;  %v3926_v33 = vld [vmem:[%s3311_s19 + $0x94] sm:$0xf] }
  0xa7   : > { %1398 = vrot.lane.b32.xlu0 %v1360_v15, %s3260_s21  ;;  %3015 = vmatprep.mubr.msk.bf16.mxu0 %vm2210_vm11, %v2159_v51  ;;  %v3847_v29 = vpop.permute.xlu1 %747  ;;  %v2716_v15 = vld [vmem:[%s3311_s19 + $0x84] sm:$0xf]  ;;  %v692_v51 = vsel %vm548_vm1, %v687_v36, %v691_v60  ;;  %v1192_v11 = vrot.slane %v1190_v53, 1  ;;  %v1368_v36 = vrot.slane %v3191_v54, 1  ;;  %v1364_v60 = vrot.slane %v2914_v6, 1 }
  0xa8   : > { %v2882_v28 = vcombine.low %v2716_v15, %v3873_v31  ;;  %v852_v41 = vrot.slane %v2866_v43, 1  ;;  %v857_v63 = vsel %vm821_vm0, %v855_v37, %v856_v50  ;;  %v3922_v31 = vcombine.low %v2780_v40, %v3912_v17  ;;  %v3929_v45 = vld [vmem:[%s3311_s19 + $0xa4] ss:$0 sps:$4 sm:$0x11]  }
  0xa9   : > { %v1897_v12 = vpop.permute.xlu0 %1896  ;;  %1512 = vrot.lane.b32.xlu1 %v3762_v57, %s3264_s25  ;;  %v1681_v57 = vsel %vm548_vm1, %v1676_v25, %v1680_v1  ;;  %v2915_v25 = vcombine.low %v2755_v52, %v2719_v26  ;;  %v1195_v1 = vshrl.u32 %v2883_v32, 16  ;;  %v1932_v37 = vsel %vm1926_vm3, %v3384_v16, %v3827_v44  ;;  %v3950_v16 = vld [vmem:[%s3311_s19 + $0xa0] sm:$0xf] }
  0xaa   : > { %v2161_v9 = vsel %vm2157_vm10, %v2128_v56, %v1897_v12  ;;  %v1185_v55 = vshll.u32 %v2882_v28, 16  ;;  %v1199_v56 = vrot.slane %v1197_v10, 1  ;;  %v1202_v12 = vshll.u32 %v3191_v54, 16 }
  0xab   : > { %1510 = vrot.lane.b32.xlu0 %v3772_v2, %s3264_s25  ;;  %3016 = vmatmul.mubr.msk.bf16.vlgmr.msra.gmra.mxu0 %vm2210_vm11, %v2161_v9  ;;  %v3862_v20 = vpop.permute.xlu1 %876  ;;  %v3904_v9 = vld [vmem:[%s3311_s19 + $0xa0] sm:$0xf]  ;;  %v854_v13 = vsel %vm821_vm0, %v852_v41, %v853_v23  ;;  %v1367_v15 = vrot.slane %v2915_v25, 1  ;;  %v3942_v52 = vcombine.low %v244_v18, %v3926_v33  ;;  %v246_v41 = vld [vmem:[%s3311_s19 + $0x9c] sm:$0xf]  ;;  %v1695_v25 = vshrl.u32 %v3922_v31, 16 }
  0xac   : > { %v1187_v14 = vrot.slane %v1185_v55, 1  ;;  %v1200_v5 = vor.u32 %v1199_v56, %v1195_v1  ;;  %v1204_v24 = vrot.slane %v1202_v12, 1  ;;  %v3963_v1 = vld [vmem:[%s3311_s19 + $0x98] ss:$0 sps:$4 sm:$0x11]  }
  0xad   : > { %v3868_v2 = vpop.permute.xlu0 %874  ;;  %1784 = vrot.lane.b32.xlu1 %v1693_v58, %s3265_s26  ;;  %v1183_v58 = vshrl.u32 %v2882_v28, 16  ;;  %v1369_v23 = vsel %vm821_vm0, %v1367_v15, %v1368_v36  ;;  %v696_v12 = vshll.u32 %v3942_v52, 16  ;;  %v3995_v18 = vld [vmem:[%s3311_s19 + $0xa4] ss:$0 sps:$4 sm:$0x11]  }
  0xae   : > { %v1205_v50 = vsel %vm548_vm1, %v1200_v5, %v1204_v24  ;;  %v1965_v10 = vsel %vm1959_vm4, %v1932_v37, %v3868_v2  ;;  %v1714_v2 = vshll.u32 %v3929_v45, 16  ;;  %v2819_v37 = vld [vmem:[%s3311_s19 + $0x9c] sm:$0xe] }
  0xaf   : > { %1782 = vrot.lane.b32.xlu0 %v1681_v57, %s3265_s26  ;;  %v3879_v39 = vpop.permute.xlu1 %988  ;;  %v3916_v57 = vcombine.low %v2782_v4, %v3904_v9  ;;  %v1188_v26 = vor.u32 %v1187_v14, %v1183_v58  ;;  %v698_v15 = vrot.slane %v696_v12, 1 }
  0xb0   : > { %v1716_v5 = vrot.slane %v1714_v2, 1  ;;  %v4021_v2 = vld [vmem:[%s3311_s19 + $0xac] sm:$0xf] }
  0xb1   : > { %v3885_v49 = vpop.permute.xlu0 %986  ;;  %761 = vrot.lane.b32.xlu1 %v680_v27, %s3262_s23  ;;  %v1709_v43 = vshll.u32 %v3916_v57, 16  ;;  %v1193_v54 = vsel %vm548_vm1, %v1188_v26, %v1192_v11  ;;  %v1707_v3 = vshrl.u32 %v3916_v57, 16  ;;  %v701_v11 = vshll.u32 %v3963_v1, 16 }
  0xb2   : > { %v1998_v44 = vsel %vm1992_vm5, %v1965_v10, %v3885_v49  ;;  %v1934_v49 = vsel %vm1926_vm3, %v3395_v30, %v3847_v29 }
  0xb3   : > { %1910 = vrot.lane.b32.xlu0 %v1872_v42, %s3266_s27  ;;  %v3893_v46 = vpop.permute.xlu1 %1260  ;;  %v1365_v42 = vrot.slane %v3192_v61, 1  ;;  %v2818_v61 = vld [vmem:[%s3311_s19 + $0x90] sm:$0xe]  ;;  %v1711_v4 = vrot.slane %v1709_v43, 1 }
  0xb4   : > { %v2962_v40 = vcombine.low %v2818_v61, %v3912_v17  ;;  %v694_v17 = vshrl.u32 %v3942_v52, 16 }
  0xb5   : > { %v1259_v0 = vpop.permute.xlu0 %1258  ;;  %763 = vrot.lane.b32.xlu1 %v692_v51, %s3262_s23  ;;  %v3939_v51 = vld [vmem:[%s3311_s19 + $0x98] ss:$0 sps:$4 sm:$0x11]   ;;  %v1366_v55 = vsel %vm821_vm0, %v1364_v60, %v1365_v42  ;;  %v1712_v26 = vor.u32 %v1711_v4, %v1707_v3  ;;  %v2720_v3 = vld [vmem:[%s3311_s19 + $0x9c] sm:$0xf] }
  0xb6   : > { %v1702_v6 = vshll.u32 %v3939_v51, 16  ;;  %v4028_v4 = vld [vmem:[%s3311_s19 + $0xa0] sm:$0xf] }
  0xb7   : > { %1912 = vrot.lane.b32.xlu0 %v1875_v48, %s3266_s27  ;;  %v3906_v34 = vpop.permute.xlu1 %1388  ;;  %v1697_v48 = vshll.u32 %v3922_v31, 16 }
  0xb8   : > { %v1704_v42 = vrot.slane %v1702_v6, 1  ;;  %v1880_v6 = vrot.slane %v3929_v45, 1 }
  0xb9   : > { %v1387_v7 = vpop.permute.xlu0 %1386  ;;  %892 = vrot.lane.b32.xlu1 %v857_v63, %s3261_s22  ;;  %v2031_v63 = vsel %vm2025_vm6, %v1998_v44, %v1259_v0  ;;  %v3972_v0 = vcombine.low %v246_v41, %v3950_v16  ;;  %v1699_v53 = vrot.slane %v1697_v48, 1  ;;  %v1877_v48 = vrot.slane %v3939_v51, 1  ;;  %v2722_v51 = vld [vmem:[%s3311_s19 + $0xa8] sm:$0xf] }
  0xba   : > { %v2064_v56 = vsel %vm2058_vm7, %v2031_v63, %v1387_v7 }
  0xbb   : > { %890 = vrot.lane.b32.xlu0 %v854_v13, %s3261_s22  ;;  %v3919_v62 = vpop.permute.xlu1 %1500  ;;  %v1967_v13 = vsel %vm1959_vm4, %v1934_v49, %v3862_v20  ;;  %v1700_v60 = vor.u32 %v1699_v53, %v1695_v25  ;;  %v706_v41 = vshrl.u32 %v3972_v0, 16 }
  0xbc   : > { %v2000_v30 = vsel %vm1992_vm5, %v1967_v13, %v3879_v39  ;;  %v2885_v13 = vcombine.low %v2722_v51, %v4021_v2 }
  0xbd   : > { %v1499_v27 = vpop.permute.xlu0 %1498  ;;  %1004 = vrot.lane.b32.xlu1 %v2883_v32, %s3259_s20  ;;  %v2033_v20 = vsel %vm2025_vm6, %v2000_v30, %v3893_v46  ;;  %v708_v46 = vshll.u32 %v3972_v0, 16  ;;  %v1705_v61 = vsel %vm548_vm1, %v1700_v60, %v1704_v42 }
  0xbe   : > { %v2097_v58 = vsel %vm2091_vm8, %v2064_v56, %v1499_v27  ;;  %v2066_v39 = vsel %vm2058_vm7, %v2033_v20, %v3906_v34  ;;  %v4048_v20 = vld [vmem:[%s3311_s19 + $0xb0] ss:$0 sps:$4 sm:$0x11]   ;;  %v1221_v45 = vshll.u32 %v2885_v13, 16 }
  0xbf   : > { %1002 = vrot.lane.b32.xlu0 %v2882_v28, %s3259_s20  ;;  %v1773_v32 = vpop.permute.xlu1 %1772  ;;  %v2099_v27 = vsel %vm2091_vm8, %v2066_v39, %v3919_v62  ;;  %v703_v62 = vrot.slane %v701_v11, 1  ;;  %v710_v44 = vrot.slane %v708_v46, 1  ;;  %v859_v11 = vrot.slane %v3963_v1, 1  ;;  %v3208_v39 = vld [vmem:[%s3311_s19 + $0xa4] ss:$0 sps:$4 sm:$0x11]  }
  0xc0   : > { %v2132_v34 = vsel %vm2124_vm9, %v2099_v27, %v1773_v32  ;;  %v699_v32 = vor.u32 %v698_v15, %v694_v17  ;;  %v1219_v46 = vshrl.u32 %v2885_v13, 16  ;;  %v2757_v27 = vld [vmem:[%s3311_s19 + $0xa8] sm:$0xe]  ;;  %v1223_v42 = vrot.slane %v1221_v45, 1 }
  0xc1   : > { %v1771_v28 = vpop.permute.xlu0 %1770  ;;  %1276 = vrot.lane.b32.xlu1 %v1205_v50, %s3263_s24  ;;  %v1876_v50 = vrot.slane %v2962_v40, 1  ;;  %v711_v56 = vor.u32 %v710_v44, %v706_v41  ;;  %v2784_v44 = vld [vmem:[%s3311_s19 + $0xa8] sm:$0xf] }
  0xc2   : > { %v2130_v29 = vsel %vm2124_vm9, %v2097_v58, %v1771_v28  ;;  %v713_v28 = vshll.u32 %v3995_v18, 16 }
  0xc3   : > { %1274 = vrot.lane.b32.xlu0 %v1193_v54, %s3263_s24  ;;  %v3977_v14 = vpop.permute.xlu1 %749  ;;  %v1717_v54 = vsel %vm548_vm1, %v1712_v26, %v1716_v5  ;;  %v1878_v25 = vsel %vm821_vm0, %v1876_v50, %v1877_v48  ;;  %v862_v5 = vrot.slane %v3995_v18, 1  ;;  %v2756_v18 = vld [vmem:[%s3311_s19 + $0x9c] sm:$0xe] }
  0xc4   : > { %v715_v12 = vrot.slane %v713_v28, 1  ;;  %v2916_v41 = vcombine.low %v2756_v18, %v4028_v4  ;;  %v4072_v28 = vld [vmem:[%s3311_s19 + $0xac] sm:$0xf] }
  0xc5   : > { %v1899_v7 = vpop.permute.xlu0 %1898  ;;  %1404 = vrot.lane.b32.xlu1 %v1369_v23, %s3260_s21  ;;  %v2963_v23 = vcombine.low %v2819_v37, %v3904_v9  ;;  %v704_v9 = vsel %vm548_vm1, %v699_v32, %v703_v62  ;;  %v4063_v37 = vld [vmem:[%s3311_s19 + $0xb8] sm:$0xf]  ;;  %v1214_v62 = vshll.u32 %v3208_v39, 16  ;;  %v2917_v32 = vcombine.low %v2757_v27, %v4021_v2 }
  0xc6   : > { %v2163_v24 = vsel %vm2157_vm10, %v2130_v29, %v1899_v7  ;;  %v2884_v29 = vcombine.low %v2720_v3, %v4028_v4  ;;  %v716_v7 = vsel %vm548_vm1, %v711_v56, %v715_v12  ;;  %v1374_v3 = vrot.slane %v4048_v20, 1 }
  0xc7   : > { %1402 = vrot.lane.b32.xlu0 %v1366_v55, %s3260_s21  ;;  %3019 = vmatprep.mubr.msk.bf16.mxu0 %vm2210_vm11, %v2163_v24  ;;  %v4000_v36 = vpop.permute.xlu1 %751  ;;  %v1879_v53 = vrot.slane %v2963_v23, 1  ;;  %v1224_v23 = vor.u32 %v1223_v42, %v1219_v46  ;;  %v1216_v2 = vrot.slane %v1214_v62, 1  ;;  %v4083_v4 = vcombine.low %v2784_v44, %v4072_v28 }
  0xc8   : > { %v1209_v17 = vshll.u32 %v2884_v29, 16  ;;  %v1373_v56 = vrot.slane %v2917_v32, 1  ;;  %v1370_v12 = vrot.slane %v2916_v41, 1 }
  0xc9   : > { %v1901_v43 = vpop.permute.xlu0 %1900  ;;  %1516 = vrot.lane.b32.xlu1 %v3916_v57, %s3264_s25  ;;  %v281_v57 = vld [vmem:[%s3311_s19 + $0x9c] sm:$0xe]  ;;  %v1881_v24 = vsel %vm821_vm0, %v1879_v53, %v1880_v6  ;;  %v1371_v53 = vrot.slane %v3208_v39, 1  ;;  %v4090_v6 = vld [vmem:[%s3311_s19 + $0xbc] ss:$0 sps:$4 sm:$0x11]  }
  0xca   : > { %v2165_v10 = vsel %vm2157_vm10, %v2132_v34, %v1901_v43  ;;  %v2869_v49 = vcombine.low %v281_v57, %v3950_v16  ;;  %v1226_v34 = vshll.u32 %v4048_v20, 16  ;;  %v2786_v43 = vld [vmem:[%s3311_s19 + $0xb4] sm:$0xf]  ;;  %v1375_v39 = vsel %vm821_vm0, %v1373_v56, %v1374_v3  ;;  %v4151_v3 = vld [vmem:[%s3311_s19 + $0xbc] ss:$0 sps:$4 sm:$0x11]  }
  0xcb   : > { %1514 = vrot.lane.b32.xlu0 %v3922_v31, %s3264_s25  ;;  %3020 = vmatmul.mubr.msk.bf16.gmra.mxu0 %vm2210_vm11, %v2165_v10  ;;  %v4016_v55 = vpop.permute.xlu1 %880  ;;  %v280_v31 = vld [vmem:[%s3311_s19 + $0x90] sm:$0xe]  ;;  %v1207_v10 = vshrl.u32 %v2884_v29, 16  ;;  %v4076_v57 = vcombine.low %v2786_v43, %v4063_v37  ;;  %v1738_v46 = vshll.u32 %v4090_v6, 16  ;;  %v1719_v42 = vshrl.u32 %v4083_v4, 16 }
  0xcc   : > { %v2868_v30 = vcombine.low %v280_v31, %v3926_v33  ;;  %v861_v40 = vrot.slane %v2869_v49, 1  ;;  %v4087_v49 = vld [vmem:[%s3311_s19 + $0xac] sm:$0xf] }
  0xcd   : > { %v4023_v63 = vpop.permute.xlu0 %878  ;;  %1788 = vrot.lane.b32.xlu1 %v1717_v54, %s3265_s26  ;;  %v1211_v54 = vrot.slane %v1209_v17, 1  ;;  %v1372_v17 = vsel %vm821_vm0, %v1370_v12, %v1371_v53  ;;  %v1731_v18 = vshrl.u32 %v4076_v57, 16  ;;  %v1740_v44 = vrot.slane %v1738_v46, 1  ;;  %v2726_v46 = vld [vmem:[%s3311_s19 + $0xc0] sm:$0xf] }
  0xce   : > { %v858_v26 = vrot.slane %v2868_v30, 1  ;;  %v863_v60 = vsel %vm821_vm0, %v861_v40, %v862_v5  ;;  %v1733_v30 = vshll.u32 %v4076_v57, 16  ;;  %v4100_v5 = vld [vmem:[%s3311_s19 + $0xb0] ss:$0 sps:$4 sm:$0x11]  }
  0xcf   : > { %1786 = vrot.lane.b32.xlu0 %v1705_v61, %s3265_s26  ;;  %v4036_v58 = vpop.permute.xlu1 %992  ;;  %v1228_v61 = vrot.slane %v1226_v34, 1  ;;  %v1212_v31 = vor.u32 %v1211_v54, %v1207_v10 }
  0xd0   : > { %v860_v50 = vsel %vm821_vm0, %v858_v26, %v859_v11  ;;  %v1721_v26 = vshll.u32 %v4083_v4, 16  ;;  %v250_v11 = vld [vmem:[%s3311_s19 + $0xb4] sm:$0xf] }
  0xd1   : > { %v4041_v16 = vpop.permute.xlu0 %990  ;;  %765 = vrot.lane.b32.xlu1 %v704_v9, %s3262_s23  ;;  %v1229_v40 = vsel %vm548_vm1, %v1224_v23, %v1228_v61 }
  0xd2   : > { %v1723_v32 = vrot.slane %v1721_v26, 1  ;;  %v737_v26 = vshll.u32 %v4151_v3, 16 }
  0xd3   : > { %1914 = vrot.lane.b32.xlu0 %v1878_v25, %s3266_s27  ;;  %v4050_v33 = vpop.permute.xlu1 %1264  ;;  %v248_v25 = vld [vmem:[%s3311_s19 + $0xa8] sm:$0xf] }
  0xd4   : > { %v4103_v20 = vcombine.low %v248_v25, %v4087_v49 }
  0xd5   : > { %v1263_v15 = vpop.permute.xlu0 %1262  ;;  %767 = vrot.lane.b32.xlu1 %v716_v7, %s3262_s23  ;;  %v1936_v7 = vsel %vm1926_vm3, %v3458_v47, %v3977_v14  ;;  %v4111_v47 = vld [vmem:[%s3311_s19 + $0xb8] sm:$0xf] }
  0xd6   : > { %v1969_v45 = vsel %vm1959_vm4, %v1936_v7, %v4023_v63  ;;  %v4119_v63 = vld [vmem:[%s3311_s19 + $0xb0] ss:$0 sps:$4 sm:$0x11]   ;;  %v720_v43 = vshll.u32 %v4103_v20, 16  ;;  %v718_v25 = vshrl.u32 %v4103_v20, 16 }
  0xd7   : > { %1916 = vrot.lane.b32.xlu0 %v1881_v24, %s3266_s27  ;;  %v4065_v1 = vpop.permute.xlu1 %1392  ;;  %v1217_v24 = vsel %vm548_vm1, %v1212_v31, %v1216_v2  ;;  %v2002_v14 = vsel %vm1992_vm5, %v1969_v45, %v4041_v16  ;;  %v1938_v16 = vsel %vm1926_vm3, %v3472_v59, %v4000_v36  ;;  %v1726_v59 = vshll.u32 %v4100_v5, 16 }
  0xd8   : > { %v2035_v27 = vsel %vm2025_vm6, %v2002_v14, %v1263_v15  ;;  %v4133_v15 = vcombine.low %v250_v11, %v4111_v47  ;;  %v1971_v10 = vsel %vm1959_vm4, %v1938_v16, %v4016_v55  ;;  %v725_v23 = vshll.u32 %v4119_v63, 16 }
  0xd9   : > { %v1391_v48 = vpop.permute.xlu0 %1390  ;;  %896 = vrot.lane.b32.xlu1 %v863_v60, %s3261_s22  ;;  %v1735_v60 = vrot.slane %v1733_v30, 1  ;;  %v2004_v36 = vsel %vm1992_vm5, %v1971_v10, %v4036_v58  ;;  %v1728_v53 = vrot.slane %v1726_v59, 1  ;;  %v1886_v59 = vrot.slane %v4090_v6, 1 }
  0xda   : > { %v2068_v34 = vsel %vm2058_vm7, %v2035_v27, %v1391_v48  ;;  %v2037_v61 = vsel %vm2025_vm6, %v2004_v36, %v4050_v33  ;;  %v722_v33 = vrot.slane %v720_v43, 1  ;;  %v730_v14 = vshrl.u32 %v4133_v15, 16  ;;  %v4182_v27 = vld [vmem:[%s3311_s19 + $0xc4] sm:$0xf] }
  0xdb   : > { %894 = vrot.lane.b32.xlu0 %v860_v50, %s3261_s22  ;;  %v4079_v51 = vpop.permute.xlu1 %1504  ;;  %v2820_v50 = vld [vmem:[%s3311_s19 + $0xa8] sm:$0xe]  ;;  %v1736_v31 = vor.u32 %v1735_v60, %v1731_v18  ;;  %v2070_v58 = vsel %vm2058_vm7, %v2037_v61, %v4065_v1  ;;  %v727_v1 = vrot.slane %v725_v23, 1  ;;  %v2724_v60 = vld [vmem:[%s3311_s19 + $0xb4] sm:$0xf]  ;;  %v2887_v10 = vcombine.low %v2726_v46, %v4182_v27 }
  0xdc   : > { %v2964_v2 = vcombine.low %v2820_v50, %v4072_v28  ;;  %v2103_v56 = vsel %vm2091_vm8, %v2070_v58, %v4079_v51  ;;  %v1724_v28 = vor.u32 %v1723_v32, %v1719_v42  ;;  %v1883_v51 = vrot.slane %v4100_v5, 1  ;;  %v4189_v42 = vld [vmem:[%s3311_s19 + $0xb8] sm:$0xf]  ;;  %v3225_v61 = vld [vmem:[%s3311_s19 + $0xc8] ss:$0 sps:$4 sm:$0x11]  }
  0xdd   : > { %v1503_v9 = vpop.permute.xlu0 %1502  ;;  %1008 = vrot.lane.b32.xlu1 %v2885_v13, %s3259_s20  ;;  %v723_v11 = vor.u32 %v722_v33, %v718_v25  ;;  %v868_v23 = vrot.slane %v4151_v3, 1  ;;  %v3226_v58 = vld [vmem:[%s3311_s19 + $0xbc] ss:$0 sps:$4 sm:$0x11]   ;;  %v2758_v3 = vld [vmem:[%s3311_s19 + $0xb4] sm:$0xe] }
  0xde   : > { %v2101_v54 = vsel %vm2091_vm8, %v2068_v34, %v1503_v9  ;;  %v732_v9 = vshll.u32 %v4133_v15, 16  ;;  %v739_v34 = vrot.slane %v737_v26, 1 }
  0xdf   : > { %1006 = vrot.lane.b32.xlu0 %v2884_v29, %s3259_s20  ;;  %v1777_v13 = vpop.permute.xlu1 %1776 }
  0xe0   : > { %v2136_v30 = vsel %vm2124_vm9, %v2103_v56, %v1777_v13  ;;  %v1741_v13 = vsel %vm548_vm1, %v1736_v31, %v1740_v44 }
  0xe1   : > { %v1775_v29 = vpop.permute.xlu0 %1774  ;;  %1280 = vrot.lane.b32.xlu1 %v1229_v40, %s3263_s24  ;;  %v2821_v40 = vld [vmem:[%s3311_s19 + $0xb4] sm:$0xe] }
  0xe2   : > { %v2134_v48 = vsel %vm2124_vm9, %v2101_v54, %v1775_v29  ;;  %v734_v29 = vrot.slane %v732_v9, 1  ;;  %v2965_v5 = vcombine.low %v2821_v40, %v4063_v37  ;;  %v728_v37 = vsel %vm548_vm1, %v723_v11, %v727_v1  ;;  %v2759_v9 = vld [vmem:[%s3311_s19 + $0xc0] sm:$0xe]  ;;  %v4226_v11 = vld [vmem:[%s3311_s19 + $0xc4] sm:$0xf] }
  0xe3   : > { %1278 = vrot.lane.b32.xlu0 %v1217_v24, %s3263_s24  ;;  %v4138_v62 = vpop.permute.xlu1 %753  ;;  %v1882_v24 = vrot.slane %v2964_v2, 1  ;;  %v865_v2 = vrot.slane %v4119_v63, 1 }
  0xe4   : > { %v735_v43 = vor.u32 %v734_v29, %v730_v14  ;;  %v1885_v32 = vrot.slane %v2965_v5, 1  ;;  %v2919_v14 = vcombine.low %v2759_v9, %v4182_v27  ;;  %v2918_v29 = vcombine.low %v2758_v3, %v4189_v42 }
  0xe5   : > { %v1903_v41 = vpop.permute.xlu0 %1902  ;;  %1408 = vrot.lane.b32.xlu1 %v1375_v39, %s3260_s21  ;;  %v1729_v39 = vsel %vm548_vm1, %v1724_v28, %v1728_v53  ;;  %v1884_v16 = vsel %vm821_vm0, %v1882_v24, %v1883_v51  ;;  %v1243_v28 = vshrl.u32 %v2887_v10, 16  ;;  %v1238_v24 = vshll.u32 %v3226_v58, 16  ;;  %v4222_v51 = vld [vmem:[%s3311_s19 + $0xd0] sm:$0xf] }
  0xe6   : > { %v2167_v55 = vsel %vm2157_vm10, %v2134_v48, %v1903_v41  ;;  %v2886_v48 = vcombine.low %v2724_v60, %v4189_v42  ;;  %v1379_v27 = vrot.slane %v2919_v14, 1  ;;  %v1376_v42 = vrot.slane %v2918_v29, 1 }
  0xe7   : > { %1406 = vrot.lane.b32.xlu0 %v1372_v17, %s3260_s21  ;;  %3023 = vmatprep.mubr.msk.bf16.mxu0 %vm2210_vm11, %v2167_v55  ;;  %v4161_v12 = vpop.permute.xlu1 %755  ;;  %v283_v17 = vld [vmem:[%s3311_s19 + $0xb4] sm:$0xe]  ;;  %v1245_v55 = vshll.u32 %v2887_v10, 16  ;;  %v1240_v60 = vrot.slane %v1238_v24, 1 }
  0xe8   : > { %v2871_v50 = vcombine.low %v283_v17, %v4111_v47  ;;  %v740_v47 = vsel %vm548_vm1, %v735_v43, %v739_v34  ;;  %v1233_v25 = vshll.u32 %v2886_v48, 16  ;;  %v1231_v40 = vshrl.u32 %v2886_v48, 16 }
  0xe9   : > { %v1905_v7 = vpop.permute.xlu0 %1904  ;;  %1520 = vrot.lane.b32.xlu1 %v4076_v57, %s3264_s25  ;;  %v1247_v53 = vrot.slane %v1245_v55, 1  ;;  %v1380_v43 = vrot.slane %v3225_v61, 1 }
  0xea   : > { %v2169_v45 = vsel %vm2157_vm10, %v2136_v30, %v1905_v7  ;;  %v867_v44 = vrot.slane %v2871_v50, 1  ;;  %v1250_v30 = vshll.u32 %v3225_v61, 16  ;;  %v2790_v7 = vld [vmem:[%s3311_s19 + $0xcc] sm:$0xf]  ;;  %v1377_v50 = vrot.slane %v3226_v58, 1 }
  0xeb   : > { %1518 = vrot.lane.b32.xlu0 %v4083_v4, %s3264_s25  ;;  %3024 = vmatmul.mubr.msk.bf16.gmra.mxu0 %vm2210_vm11, %v2169_v45  ;;  %v4175_v57 = vpop.permute.xlu1 %884  ;;  %v282_v4 = vld [vmem:[%s3311_s19 + $0xa8] sm:$0xe]  ;;  %v1235_v45 = vrot.slane %v1233_v25, 1  ;;  %v2935_v17 = vcombine.low %v2790_v7, %v4222_v51  ;;  %v2822_v7 = vld [vmem:[%s3311_s19 + $0xc0] sm:$0xe] }
  0xec   : > { %v2870_v36 = vcombine.low %v282_v4, %v4087_v49  ;;  %v1887_v49 = vsel %vm821_vm0, %v1885_v32, %v1886_v59  ;;  %v869_v56 = vsel %vm821_vm0, %v867_v44, %v868_v23  ;;  %v1252_v5 = vrot.slane %v1250_v30, 1 }
  0xed   : > { %v4184_v18 = vpop.permute.xlu0 %882  ;;  %1792 = vrot.lane.b32.xlu1 %v1741_v13, %s3265_s26  ;;  %v2788_v13 = vld [vmem:[%s3311_s19 + $0xc0] sm:$0xf]  ;;  %v1236_v4 = vor.u32 %v1235_v45, %v1231_v40  ;;  %v1940_v32 = vsel %vm1926_vm3, %v3543_v21, %v4138_v62  ;;  %v1381_v62 = vsel %vm821_vm0, %v1379_v27, %v1380_v43  ;;  %v2966_v29 = vcombine.low %v2822_v7, %v4226_v11 }
  0xee   : > { %v864_v31 = vrot.slane %v2870_v36, 1  ;;  %v1757_v36 = vshll.u32 %v2935_v17, 16 }
  0xef   : > { %1790 = vrot.lane.b32.xlu0 %v1729_v39, %s3265_s26  ;;  %v4197_v54 = vpop.permute.xlu1 %996  ;;  %v1248_v39 = vor.u32 %v1247_v53, %v1243_v28  ;;  %v1241_v23 = vsel %vm548_vm1, %v1236_v4, %v1240_v60  ;;  %v2823_v53 = vld [vmem:[%s3311_s19 + $0xcc] sm:$0xe] }
  0xf0   : > { %v866_v63 = vsel %vm821_vm0, %v864_v31, %v865_v2  ;;  %v1755_v31 = vshrl.u32 %v2935_v17, 16  ;;  %v1942_v2 = vsel %vm1926_vm3, %v3559_v35, %v4161_v12  ;;  %v1759_v58 = vrot.slane %v1757_v36, 1 }
  0xf1   : > { %v995_v41 = vpop.permute.xlu0 %994  ;;  %769 = vrot.lane.b32.xlu1 %v728_v37, %s3262_s23  ;;  %v4235_v37 = vld [vmem:[%s3311_s19 + $0xd4] ss:$0 sps:$4 sm:$0x11]   ;;  %v1253_v59 = vsel %vm548_vm1, %v1248_v39, %v1252_v5  ;;  %v2967_v24 = vcombine.low %v2823_v53, %v4222_v51 }
  0xf2   : > { %v1760_v45 = vor.u32 %v1759_v58, %v1755_v31 }
  0xf3   : > { %1918 = vrot.lane.b32.xlu0 %v1884_v16, %s3266_s27  ;;  %v4207_v6 = vpop.permute.xlu1 %1268  ;;  %v2934_v16 = vcombine.low %v2788_v13, %v4226_v11  ;;  %v1891_v4 = vrot.slane %v2967_v24, 1  ;;  %v1888_v11 = vrot.slane %v2966_v29, 1 }
  0xf5   : > { %v1267_v33 = vpop.permute.xlu0 %1266  ;;  %771 = vrot.lane.b32.xlu1 %v740_v47, %s3262_s23  ;;  %v1973_v47 = vsel %vm1959_vm4, %v1940_v32, %v4184_v18  ;;  %v1745_v55 = vshll.u32 %v2934_v16, 16  ;;  %v1762_v18 = vshll.u32 %v4235_v37, 16  ;;  %v1743_v25 = vshrl.u32 %v2934_v16, 16 }
  0xf6   : > { %v2006_v61 = vsel %vm1992_vm5, %v1973_v47, %v995_v41 }
  0xf7   : > { %1920 = vrot.lane.b32.xlu0 %v1887_v49, %s3266_s27  ;;  %v4218_v1 = vpop.permute.xlu1 %1396  ;;  %v2039_v21 = vsel %vm2025_vm6, %v2006_v61, %v1267_v33  ;;  %v1975_v33 = vsel %vm1959_vm4, %v1942_v2, %v4175_v57 }
  0xf8   : > { %v2008_v30 = vsel %vm1992_vm5, %v1975_v33, %v4197_v54  ;;  %v1764_v54 = vrot.slane %v1762_v18, 1 }
  0xf9   : > { %v1395_v26 = vpop.permute.xlu0 %1394  ;;  %900 = vrot.lane.b32.xlu1 %v869_v56, %s3261_s22  ;;  %v1747_v56 = vrot.slane %v1745_v55, 1 }
  0xfa   : > { %v2072_v41 = vsel %vm2058_vm7, %v2039_v21, %v1395_v26  ;;  %v1765_v51 = vsel %vm548_vm1, %v1760_v45, %v1764_v54 }
  0xfb   : > { %898 = vrot.lane.b32.xlu0 %v866_v63, %s3261_s22  ;;  %v1509_v46 = vpop.permute.xlu1 %1508  ;;  %v2041_v63 = vsel %vm2025_vm6, %v2008_v30, %v4207_v6  ;;  %v1748_v14 = vor.u32 %v1747_v56, %v1743_v25 }
  0xfc   : > { %v2074_v57 = vsel %vm2058_vm7, %v2041_v63, %v4218_v1 }
  0xfd   : > { %v1507_v34 = vpop.permute.xlu0 %1506  ;;  %1012 = vrot.lane.b32.xlu1 %v2887_v10, %s3259_s20  ;;  %v3232_v10 = vld [vmem:[%s3311_s19 + $0xc8] ss:$0 sps:$4 sm:$0x11]   ;;  %v2107_v26 = vsel %vm2091_vm8, %v2074_v57, %v1509_v46  ;;  %v1892_v46 = vrot.slane %v4235_v37, 1 }
  0xfe   : > { %v2105_v9 = vsel %vm2091_vm8, %v2072_v41, %v1507_v34  ;;  %v1750_v28 = vshll.u32 %v3232_v10, 16  ;;  %v1889_v27 = vrot.slane %v3232_v10, 1 }
  0xff   : > { %1010 = vrot.lane.b32.xlu0 %v2886_v48, %s3259_s20  ;;  %v1781_v44 = vpop.permute.xlu1 %1780  ;;  %v1378_v48 = vsel %vm821_vm0, %v1376_v42, %v1377_v50 }
 0x100   : > { %v1752_v6 = vrot.slane %v1750_v28, 1  ;;  %v2140_v39 = vsel %vm2124_vm9, %v2107_v26, %v1781_v44  ;;  %v1890_v42 = vsel %vm821_vm0, %v1888_v11, %v1889_v27 }
 0x101   : > { %v1779_v49 = vpop.permute.xlu0 %1778  ;;  %1284 = vrot.lane.b32.xlu1 %v1253_v59, %s3263_s24 }
 0x102   : > { %v2138_v35 = vsel %vm2124_vm9, %v2105_v9, %v1779_v49  ;;  %v1753_v34 = vsel %vm548_vm1, %v1748_v14, %v1752_v6 }
 0x103   : > { %1282 = vrot.lane.b32.xlu0 %v1241_v23, %s3263_s24  ;;  %v758_v3 = vpop.permute.xlu1 %757 }
 0x104   : > { %v1944_v23 = vsel %vm1926_vm3, %v3648_v8, %v758_v3 }
 0x105   : > { %v1907_v12 = vpop.permute.xlu0 %1906  ;;  %1412 = vrot.lane.b32.xlu1 %v1381_v62, %s3260_s21 }
 0x106   : > { %v2171_v40 = vsel %vm2157_vm10, %v2138_v35, %v1907_v12 }
 0x107   : > { %1410 = vrot.lane.b32.xlu0 %v1378_v48, %s3260_s21  ;;  %3027 = vmatprep.mubr.msk.bf16.mxu0 %vm2210_vm11, %v2171_v40  ;;  %v760_v13 = vpop.permute.xlu1 %759 }
 0x108   : > { %v1946_v21 = vsel %vm1926_vm3, %v3664_v22, %v760_v13 }
 0x109   : > { %v1909_v5 = vpop.permute.xlu0 %1908  ;;  %1524 = vrot.lane.b32.xlu1 %v2935_v17, %s3264_s25  ;;  %v1893_v17 = vsel %vm821_vm0, %v1891_v4, %v1892_v46 }
 0x10a   : > { %v2173_v1 = vsel %vm2157_vm10, %v2140_v39, %v1909_v5 }
 0x10b   : > { %1522 = vrot.lane.b32.xlu0 %v2934_v16, %s3264_s25  ;;  %3028 = vmatmul.mubr.msk.bf16.gmra.mxu0 %vm2210_vm11, %v2173_v1  ;;  %v889_v60 = vpop.permute.xlu1 %888 }
 0x10c   : > { %v1979_v48 = vsel %vm1959_vm4, %v1946_v21, %v889_v60 }
 0x10d   : > { %v887_v43 = vpop.permute.xlu0 %886  ;;  %1796 = vrot.lane.b32.xlu1 %v1765_v51, %s3265_s26 }
 0x10e   : > { %v1977_v10 = vsel %vm1959_vm4, %v1944_v23, %v887_v43 }
 0x10f   : > { %1794 = vrot.lane.b32.xlu0 %v1753_v34, %s3265_s26  ;;  %v1001_v16 = vpop.permute.xlu1 %1000 }
 0x110   : > { %v2012_v8 = vsel %vm1992_vm5, %v1979_v48, %v1001_v16 }
 0x111   : > { %v999_v50 = vpop.permute.xlu0 %998  ;;  %1924 = vrot.lane.b32.xlu1 %v1893_v17, %s3266_s27 }
 0x112   : > { %v2010_v61 = vsel %vm1992_vm5, %v1977_v10, %v999_v50 }
 0x113   : > { %1922 = vrot.lane.b32.xlu0 %v1890_v42, %s3266_s27  ;;  %v1273_v37 = vpop.permute.xlu1 %1272 }
 0x114   : > { %v2045_v25 = vsel %vm2025_vm6, %v2012_v8, %v1273_v37 }
 0x115   : > { %v1271_v32 = vpop.permute.xlu0 %1270 }
 0x116   : > { %v2043_v31 = vsel %vm2025_vm6, %v2010_v61, %v1271_v32 }
 0x117   : > { %v1401_v59 = vpop.permute.xlu1 %1400 }
 0x118   : > { %v2078_v9 = vsel %vm2058_vm7, %v2045_v25, %v1401_v59 }
 0x119   : > { %v1399_v36 = vpop.permute.xlu0 %1398 }
 0x11a   : > { %v2076_v62 = vsel %vm2058_vm7, %v2043_v31, %v1399_v36 }
 0x11b   : > { %v1513_v47 = vpop.permute.xlu1 %1512 }
 0x11c   : > { %v2111_v22 = vsel %vm2091_vm8, %v2078_v9, %v1513_v47 }
 0x11d   : > { %v1511_v44 = vpop.permute.xlu0 %1510 }
 0x11e   : > { %v2109_v18 = vsel %vm2091_vm8, %v2076_v62, %v1511_v44 }
 0x11f   : > { %v1785_v55 = vpop.permute.xlu1 %1784 }
 0x120   : > { %v2144_v56 = vsel %vm2124_vm9, %v2111_v22, %v1785_v55 }
 0x121   : > { %v1783_v49 = vpop.permute.xlu0 %1782 }
 0x122   : > { %v2142_v41 = vsel %vm2124_vm9, %v2109_v18, %v1783_v49 }
 0x123   : > { %v762_v2 = vpop.permute.xlu1 %761 }
 0x124   : > { %v1948_v26 = vsel %vm1926_vm3, %v3797_v19, %v762_v2 }
 0x125   : > { %v1911_v58 = vpop.permute.xlu0 %1910 }
 0x126   : > { %v2175_v33 = vsel %vm2157_vm10, %v2142_v41, %v1911_v58 }
 0x127   : > { %3031 = vmatprep.mubr.msk.bf16.mxu1 %vm2210_vm11, %v2175_v33  ;;  %v764_v3 = vpop.permute.xlu1 %763 }
 0x128   : > { %v1950_v5 = vsel %vm1926_vm3, %v3822_v38, %v764_v3 }
 0x129   : > { %v1913_v28 = vpop.permute.xlu0 %1912 }
 0x12a   : > { %v2177_v53 = vsel %vm2157_vm10, %v2144_v56, %v1913_v28 }
 0x12b   : > { %3032 = vmatmul.mubr.msk.bf16.vlgmr.msra.gmra.mxu1 %vm2210_vm11, %v2177_v53  ;;  %v893_v30 = vpop.permute.xlu1 %892 }
 0x12c   : > { %v1983_v51 = vsel %vm1959_vm4, %v1950_v5, %v893_v30 }
 0x12d   : > { %v891_v35 = vpop.permute.xlu0 %890 }
 0x12e   : > { %v1981_v13 = vsel %vm1959_vm4, %v1948_v26, %v891_v35 }
 0x12f   : > { %v1005_v12 = vpop.permute.xlu1 %1004 }
 0x130   : > { %v2016_v19 = vsel %vm1992_vm5, %v1983_v51, %v1005_v12 }
 0x131   : > { %v1003_v7 = vpop.permute.xlu0 %1002 }
 0x132   : > { %v2014_v6 = vsel %vm1992_vm5, %v1981_v13, %v1003_v7 }
 0x133   : > { %v1277_v63 = vpop.permute.xlu1 %1276 }
 0x134   : > { %v2049_v11 = vsel %vm2025_vm6, %v2016_v19, %v1277_v63 }
 0x135   : > { %v1275_v40 = vpop.permute.xlu0 %1274 }
 0x136   : > { %v2047_v39 = vsel %vm2025_vm6, %v2014_v6, %v1275_v40 }
 0x137   : > { %v1405_v57 = vpop.permute.xlu1 %1404 }
 0x138   : > { %v2082_v43 = vsel %vm2058_vm7, %v2049_v11, %v1405_v57 }
 0x139   : > { %v1403_v45 = vpop.permute.xlu0 %1402 }
 0x13a   : > { %v2080_v1 = vsel %vm2058_vm7, %v2047_v39, %v1403_v45 }
 0x13b   : > { %v1517_v54 = vpop.permute.xlu1 %1516 }
 0x13c   : > { %v2115_v38 = vsel %vm2091_vm8, %v2082_v43, %v1517_v54 }
 0x13d   : > { %v1515_v24 = vpop.permute.xlu0 %1514 }
 0x13e   : > { %v2113_v4 = vsel %vm2091_vm8, %v2080_v1, %v1515_v24 }
 0x13f   : > { %v1789_v14 = vpop.permute.xlu1 %1788 }
 0x140   : > { %v2148_v16 = vsel %vm2124_vm9, %v2115_v38, %v1789_v14 }
 0x141   : > { %v1787_v29 = vpop.permute.xlu0 %1786 }
 0x142   : > { %v2146_v60 = vsel %vm2124_vm9, %v2113_v4, %v1787_v29 }
 0x143   : > { %v766_v46 = vpop.permute.xlu1 %765 }
 0x144   : > { %v1952_v49 = vsel %vm1926_vm3, %v3942_v52, %v766_v46 }
 0x145   : > { %v1915_v34 = vpop.permute.xlu0 %1914 }
 0x146   : > { %v2179_v27 = vsel %vm2157_vm10, %v2146_v60, %v1915_v34 }
 0x147   : > { %3035 = vmatprep.mubr.msk.bf16.mxu1 %vm2210_vm11, %v2179_v27  ;;  %v768_v17 = vpop.permute.xlu1 %767 }
 0x148   : > { %v1954_v2 = vsel %vm1926_vm3, %v3972_v0, %v768_v17 }
 0x149   : > { %v1917_v42 = vpop.permute.xlu0 %1916 }
 0x14a   : > { %v2181_v50 = vsel %vm2157_vm10, %v2148_v16, %v1917_v42 }
 0x14b   : > { %3036 = vmatmul.mubr.msk.bf16.gmra.mxu1 %vm2210_vm11, %v2181_v50  ;;  %v897_v37 = vpop.permute.xlu1 %896 }
 0x14c   : > { %v1987_v41 = vsel %vm1959_vm4, %v1954_v2, %v897_v37 }
 0x14d   : > { %v895_v32 = vpop.permute.xlu0 %894 }
 0x14e   : > { %v1985_v31 = vsel %vm1959_vm4, %v1952_v49, %v895_v32 }
 0x14f   : > { %v1009_v59 = vpop.permute.xlu1 %1008 }
 0x150   : > { %v2020_v52 = vsel %vm1992_vm5, %v1987_v41, %v1009_v59 }
 0x151   : > { %v1007_v36 = vpop.permute.xlu0 %1006 }
 0x152   : > { %v2018_v62 = vsel %vm1992_vm5, %v1985_v31, %v1007_v36 }
 0x153   : > { %v1281_v47 = vpop.permute.xlu1 %1280 }
 0x154   : > { %v2053_v22 = vsel %vm2025_vm6, %v2020_v52, %v1281_v47 }
 0x155   : > { %v1279_v44 = vpop.permute.xlu0 %1278 }
 0x156   : > { %v2051_v18 = vsel %vm2025_vm6, %v2018_v62, %v1279_v44 }
 0x157   : > { %v1409_v23 = vpop.permute.xlu1 %1408 }
 0x158   : > { %v2086_v56 = vsel %vm2058_vm7, %v2053_v22, %v1409_v23 }
 0x159   : > { %v1407_v10 = vpop.permute.xlu0 %1406 }
 0x15a   : > { %v2084_v8 = vsel %vm2058_vm7, %v2051_v18, %v1407_v10 }
 0x15b   : > { %v1521_v55 = vpop.permute.xlu1 %1520 }
 0x15c   : > { %v2119_v0 = vsel %vm2091_vm8, %v2086_v56, %v1521_v55 }
 0x15d   : > { %v1519_v61 = vpop.permute.xlu0 %1518 }
 0x15e   : > { %v2117_v58 = vsel %vm2091_vm8, %v2084_v8, %v1519_v61 }
 0x15f   : > { %v1793_v21 = vpop.permute.xlu1 %1792 }
 0x160   : > { %v2152_v53 = vsel %vm2124_vm9, %v2119_v0, %v1793_v21 }
 0x161   : > { %v1791_v48 = vpop.permute.xlu0 %1790 }
 0x162   : > { %v2150_v33 = vsel %vm2124_vm9, %v2117_v58, %v1791_v48 }
 0x163   : > { %v770_v25 = vpop.permute.xlu1 %769 }
 0x164   : > { %v1956_v38 = vsel %vm1926_vm3, %v4103_v20, %v770_v25 }
 0x165   : > { %v1919_v9 = vpop.permute.xlu0 %1918 }
 0x166   : > { %v2183_v3 = vsel %vm2157_vm10, %v2150_v33, %v1919_v9 }
 0x167   : > { %3039 = vmatprep.mubr.msk.bf16.mxu1 %vm2210_vm11, %v2183_v3  ;;  %v772_v28 = vpop.permute.xlu1 %771 }
 0x168   : > { %v1958_v43 = vsel %vm1926_vm3, %v4133_v15, %v772_v28 }
 0x169   : > { %v1921_v30 = vpop.permute.xlu0 %1920 }
 0x16a   : > { %v2185_v35 = vsel %vm2157_vm10, %v2152_v53, %v1921_v30 }
 0x16b   : > { %v3017_v12 = vpop.f32.mrf.mxu0  ;;  %3040 = vmatmul.mubr.msk.bf16.gmra.mxu1 %vm2210_vm11, %v2185_v35  ;;  %v901_v7 = vpop.permute.xlu1 %900 }
 0x16c   : > { %2410 = vst [vmem:[%s4353_s10 + $0x10] sm:$0xff] %v3017_v12  ;;  %v2479_v6 = vmul.f32 %v3017_v12, %v3017_v12  ;;  %v1991_v17 = vsel %vm1959_vm4, %v1958_v43, %v901_v7 }
 0x16d   : > { %v2281_v63 = vpop.f32.mrf.mxu0  ;;  %v899_v40 = vpop.permute.xlu0 %898 }
 0x16e   : > { %2408 = vst [vmem:[%s4353_s10] sm:$0xff] %v2281_v63  ;;  %v2477_v26 = vmul.f32 %v2281_v63, %v2281_v63  ;;  %v1989_v16 = vsel %vm1959_vm4, %v1956_v38, %v899_v40 }
 0x16f   : > { %v3018_v57 = vpop.f32.mrf.mxu0  ;;  %v1013_v45 = vpop.permute.xlu1 %1012 }
 0x170   : > { %2411 = vst [vmem:[%s4353_s10 + $0x18] sm:$0xff] %v3018_v57  ;;  %v2480_v51 = vmul.f32 %v3018_v57, %v3018_v57  ;;  %v2024_v42 = vsel %vm1992_vm5, %v1991_v17, %v1013_v45 }
 0x171   : > { %v2284_v54 = vpop.f32.mrf.mxu0  ;;  %v1011_v24 = vpop.permute.xlu0 %1010 }
 0x172   : > { %2409 = vst [vmem:[%s4353_s10 + $0x8] sm:$0xff] %v2284_v54  ;;  %v2440_v13 = vadd.f32 %v2284_v54, %v2281_v63  ;;  %v2478_v14 = vmul.f32 %v2284_v54, %v2284_v54  ;;  %v2022_v37 = vsel %vm1992_vm5, %v1989_v16, %v1011_v24 }
 0x173   : > { %v1285_v5 = vpop.permute.xlu1 %1284 }
 0x174   : > { %v2441_v29 = vadd.f32 %v3017_v12, %v2440_v13  ;;  %v2509_v39 = vadd.f32 %v2478_v14, %v2477_v26  ;;  %v2057_v32 = vsel %vm2025_vm6, %v2024_v42, %v1285_v5 }
 0x175   : > { %v1283_v1 = vpop.permute.xlu0 %1282 }
 0x176   : > { %v2510_v4 = vadd.f32 %v2509_v39, %v2479_v6  ;;  %v2442_v46 = vadd.f32 %v3018_v57, %v2441_v29  ;;  %v2055_v36 = vsel %vm2025_vm6, %v2022_v37, %v1283_v1 }
 0x177   : > { %v1413_v19 = vpop.permute.xlu1 %1412 }
 0x178   : > { %v2511_v60 = vadd.f32 %v2510_v4, %v2480_v51  ;;  %v2090_v15 = vsel %vm2058_vm7, %v2057_v32, %v1413_v19 }
 0x179   : > { %v1411_v34 = vpop.permute.xlu0 %1410 }
 0x17a   : > { %v2088_v20 = vsel %vm2058_vm7, %v2055_v36, %v1411_v34 }
 0x17b   : > { %v1525_v11 = vpop.permute.xlu1 %1524 }
 0x17c   : > { %v2123_v47 = vsel %vm2091_vm8, %v2090_v15, %v1525_v11 }
 0x17d   : > { %v1523_v27 = vpop.permute.xlu0 %1522 }
 0x17e   : > { %v2121_v44 = vsel %vm2091_vm8, %v2088_v20, %v1523_v27 }
 0x17f   : > { %v1797_v50 = vpop.permute.xlu1 %1796 }
 0x180   : > { %v2156_v23 = vsel %vm2124_vm9, %v2123_v47, %v1797_v50 }
 0x181   : > { %v1795_v59 = vpop.permute.xlu0 %1794 }
 0x182   : > { %v2154_v55 = vsel %vm2124_vm9, %v2121_v44, %v1795_v59 }
 0x183   : > { %v1925_v10 = vpop.permute.xlu1 %1924 }
 0x184   : > { %v2189_v61 = vsel %vm2157_vm10, %v2156_v23, %v1925_v10 }
 0x185   : > { %v1923_v49 = vpop.permute.xlu0 %1922 }
 0x186   : > { %v2187_v31 = vsel %vm2157_vm10, %v2154_v55, %v1923_v49 }
 0x187   : > { %3043 = vmatprep.mubr.msk.bf16.mxu1 %vm2210_vm11, %v2187_v31 }
 0x188   : > { %3044 = vmatmul.mubr.msk.bf16.gmra.mxu1 %vm2210_vm11, %v2189_v61 }
 0x18b   : > { %v3021_v21 = vpop.f32.mrf.mxu0 }
 0x18c   : > { %2414 = vst [vmem:[%s4353_s10 + $0x30] sm:$0xff] %v3021_v21  ;;  %v2483_v52 = vmul.f32 %v3021_v21, %v3021_v21 }
 0x18d   : > { %v2297_v62 = vpop.f32.mrf.mxu0 }
 0x18e   : > { %2412 = vst [vmem:[%s4353_s10 + $0x20] sm:$0xff] %v2297_v62  ;;  %v2443_v48 = vadd.f32 %v2442_v46, %v2297_v62  ;;  %v2481_v18 = vmul.f32 %v2297_v62, %v2297_v62 }
 0x18f   : > { %v3022_v2 = vpop.f32.mrf.mxu0 }
 0x190   : > { %v2512_v8 = vadd.f32 %v2511_v60, %v2481_v18  ;;  %2415 = vst [vmem:[%s4353_s10 + $0x38] sm:$0xff] %v3022_v2  ;;  %v2484_v22 = vmul.f32 %v3022_v2, %v3022_v2 }
 0x191   : > { %v2300_v41 = vpop.f32.mrf.mxu0 }
 0x192   : > { %2413 = vst [vmem:[%s4353_s10 + $0x28] sm:$0xff] %v2300_v41  ;;  %v2444_v58 = vadd.f32 %v2443_v48, %v2300_v41  ;;  %v2482_v25 = vmul.f32 %v2300_v41, %v2300_v41 }
 0x194   : > { %v2445_v33 = vadd.f32 %v3021_v21, %v2444_v58  ;;  %v2513_v9 = vadd.f32 %v2512_v8, %v2482_v25 }
 0x196   : > { %v2514_v3 = vadd.f32 %v2513_v9, %v2483_v52  ;;  %v2446_v56 = vadd.f32 %v3022_v2, %v2445_v33 }
 0x198   : > { %v2515_v0 = vadd.f32 %v2514_v3, %v2484_v22 }
 0x1ab   : > { %v3025_v28 = vpop.f32.mrf.mxu0 }
 0x1ac   : > { %2418 = vst [vmem:[%s4353_s10 + $0x50] sm:$0xff] %v3025_v28  ;;  %v2487_v45 = vmul.f32 %v3025_v28, %v3025_v28 }
 0x1ad   : > { %v2313_v53 = vpop.f32.mrf.mxu0 }
 0x1ae   : > { %2416 = vst [vmem:[%s4353_s10 + $0x40] sm:$0xff] %v2313_v53  ;;  %v2447_v30 = vadd.f32 %v2446_v56, %v2313_v53  ;;  %v2485_v35 = vmul.f32 %v2313_v53, %v2313_v53 }
 0x1af   : > { %v3026_v12 = vpop.f32.mrf.mxu0 }
 0x1b0   : > { %v2516_v7 = vadd.f32 %v2515_v0, %v2485_v35  ;;  %2419 = vst [vmem:[%s4353_s10 + $0x58] sm:$0xff] %v3026_v12  ;;  %v2488_v26 = vmul.f32 %v3026_v12, %v3026_v12 }
 0x1b1   : > { %v2316_v63 = vpop.f32.mrf.mxu0 }
 0x1b2   : > { %2417 = vst [vmem:[%s4353_s10 + $0x48] sm:$0xff] %v2316_v63  ;;  %v2448_v40 = vadd.f32 %v2447_v30, %v2316_v63  ;;  %v2486_v57 = vmul.f32 %v2316_v63, %v2316_v63 }
 0x1b4   : > { %v2449_v54 = vadd.f32 %v3025_v28, %v2448_v40  ;;  %v2517_v24 = vadd.f32 %v2516_v7, %v2486_v57 }
 0x1b6   : > { %v2518_v13 = vadd.f32 %v2517_v24, %v2487_v45  ;;  %v2450_v14 = vadd.f32 %v3026_v12, %v2449_v54 }
 0x1b8   : > { %v2519_v6 = vadd.f32 %v2518_v13, %v2488_v26 }
 0x1cb   : > { %v3029_v29 = vpop.f32.mrf.mxu0 }
 0x1cc   : > { %2422 = vst [vmem:[%s4353_s10 + $0x70] sm:$0xff] %v3029_v29  ;;  %v2491_v34 = vmul.f32 %v3029_v29, %v3029_v29 }
 0x1cd   : > { %v2329_v39 = vpop.f32.mrf.mxu0 }
 0x1ce   : > { %2420 = vst [vmem:[%s4353_s10 + $0x60] sm:$0xff] %v2329_v39  ;;  %v2451_v5 = vadd.f32 %v2450_v14, %v2329_v39  ;;  %v2489_v1 = vmul.f32 %v2329_v39, %v2329_v39 }
 0x1cf   : > { %v3030_v51 = vpop.f32.mrf.mxu0 }
 0x1d0   : > { %v2520_v4 = vadd.f32 %v2519_v6, %v2489_v1  ;;  %2423 = vst [vmem:[%s4353_s10 + $0x78] sm:$0xff] %v3030_v51  ;;  %v2492_v43 = vmul.f32 %v3030_v51, %v3030_v51 }
 0x1d1   : > { %v2332_v46 = vpop.f32.mrf.mxu0 }
 0x1d2   : > { %2421 = vst [vmem:[%s4353_s10 + $0x68] sm:$0xff] %v2332_v46  ;;  %v2452_v19 = vadd.f32 %v2451_v5, %v2332_v46  ;;  %v2490_v60 = vmul.f32 %v2332_v46, %v2332_v46 }
 0x1d4   : > { %v2453_v11 = vadd.f32 %v3029_v29, %v2452_v19  ;;  %v2521_v27 = vadd.f32 %v2520_v4, %v2490_v60 }
 0x1d6   : > { %v2522_v38 = vadd.f32 %v2521_v27, %v2491_v34  ;;  %v2454_v17 = vadd.f32 %v3030_v51, %v2453_v11 }
 0x1d8   : > { %v2523_v16 = vadd.f32 %v2522_v38, %v2492_v43 }
 0x1eb   : > { %v3033_v42 = vpop.f32.mrf.mxu1 }
 0x1ec   : > { %2426 = vst [vmem:[%s4353_s10 + $0x90] sm:$0xff] %v3033_v42  ;;  %v2495_v44 = vmul.f32 %v3033_v42, %v3033_v42 }
 0x1ed   : > { %v2345_v50 = vpop.f32.mrf.mxu1 }
 0x1ee   : > { %2424 = vst [vmem:[%s4353_s10 + $0x80] sm:$0xff] %v2345_v50  ;;  %v2455_v37 = vadd.f32 %v2454_v17, %v2345_v50  ;;  %v2493_v32 = vmul.f32 %v2345_v50, %v2345_v50 }
 0x1ef   : > { %v3034_v59 = vpop.f32.mrf.mxu1 }
 0x1f0   : > { %v2524_v36 = vadd.f32 %v2523_v16, %v2493_v32  ;;  %2427 = vst [vmem:[%s4353_s10 + $0x98] sm:$0xff] %v3034_v59  ;;  %v2496_v55 = vmul.f32 %v3034_v59, %v3034_v59 }
 0x1f1   : > { %v2348_v15 = vpop.f32.mrf.mxu1 }
 0x1f2   : > { %2425 = vst [vmem:[%s4353_s10 + $0x88] sm:$0xff] %v2348_v15  ;;  %v2456_v20 = vadd.f32 %v2455_v37, %v2348_v15  ;;  %v2494_v47 = vmul.f32 %v2348_v15, %v2348_v15 }
 0x1f4   : > { %v2457_v23 = vadd.f32 %v3033_v42, %v2456_v20  ;;  %v2525_v10 = vadd.f32 %v2524_v36, %v2494_v47 }
 0x1f6   : > { %v2526_v61 = vadd.f32 %v2525_v10, %v2495_v44  ;;  %v2458_v49 = vadd.f32 %v3034_v59, %v2457_v23 }
 0x1f8   : > { %v2527_v31 = vadd.f32 %v2526_v61, %v2496_v55 }
 0x20b   : > { %v3037_v21 = vpop.f32.mrf.mxu1 }
 0x20c   : > { %2430 = vst [vmem:[%s4353_s10 + $0xb0] sm:$0xff] %v3037_v21  ;;  %v2499_v56 = vmul.f32 %v3037_v21, %v3037_v21 }
 0x20d   : > { %v2361_v62 = vpop.f32.mrf.mxu1 }
 0x20e   : > { %2428 = vst [vmem:[%s4353_s10 + $0xa0] sm:$0xff] %v2361_v62  ;;  %v2497_v25 = vmul.f32 %v2361_v62, %v2361_v62  ;;  %v2459_v52 = vadd.f32 %v2458_v49, %v2361_v62 }
 0x20f   : > { %v3038_v48 = vpop.f32.mrf.mxu1 }
 0x210   : > { %2431 = vst [vmem:[%s4353_s10 + $0xb8] sm:$0xff] %v3038_v48  ;;  %v2528_v9 = vadd.f32 %v2527_v31, %v2497_v25  ;;  %v2500_v53 = vmul.f32 %v3038_v48, %v3038_v48 }
 0x211   : > { %v2364_v18 = vpop.f32.mrf.mxu1 }
 0x212   : > { %2429 = vst [vmem:[%s4353_s10 + $0xa8] sm:$0xff] %v2364_v18  ;;  %v2498_v33 = vmul.f32 %v2364_v18, %v2364_v18  ;;  %v2460_v22 = vadd.f32 %v2459_v52, %v2364_v18 }
 0x214   : > { %v2529_v3 = vadd.f32 %v2528_v9, %v2498_v33  ;;  %v2461_v0 = vadd.f32 %v3037_v21, %v2460_v22 }
 0x216   : > { %v2530_v28 = vadd.f32 %v2529_v3, %v2499_v56  ;;  %v2462_v30 = vadd.f32 %v3038_v48, %v2461_v0 }
 0x218   : > { %v2531_v7 = vadd.f32 %v2530_v28, %v2500_v53 }
 0x22b   : > { %v3041_v2 = vpop.f32.mrf.mxu1 }
 0x22c   : > { %2434 = vst [vmem:[%s4353_s10 + $0xd0] sm:$0xff] %v3041_v2  ;;  %v2503_v54 = vmul.f32 %v3041_v2, %v3041_v2 }
 0x22d   : > { %v2377_v8 = vpop.f32.mrf.mxu1 }
 0x22e   : > { %2432 = vst [vmem:[%s4353_s10 + $0xc0] sm:$0xff] %v2377_v8  ;;  %v2501_v35 = vmul.f32 %v2377_v8, %v2377_v8  ;;  %v2463_v12 = vadd.f32 %v2462_v30, %v2377_v8 }
 0x22f   : > { %v3042_v41 = vpop.f32.mrf.mxu1 }
 0x230   : > { %2435 = vst [vmem:[%s4353_s10 + $0xd8] sm:$0xff] %v3042_v41  ;;  %v2532_v40 = vadd.f32 %v2531_v7, %v2501_v35  ;;  %v2504_v6 = vmul.f32 %v3042_v41, %v3042_v41 }
 0x231   : > { %v2380_v58 = vpop.f32.mrf.mxu1 }
 0x232   : > { %2433 = vst [vmem:[%s4353_s10 + $0xc8] sm:$0xff] %v2380_v58  ;;  %v2502_v63 = vmul.f32 %v2380_v58, %v2380_v58  ;;  %v2464_v57 = vadd.f32 %v2463_v12, %v2380_v58 }
 0x234   : > { %v2533_v45 = vadd.f32 %v2532_v40, %v2502_v63  ;;  %v2465_v24 = vadd.f32 %v3041_v2, %v2464_v57 }
 0x236   : > { %v2534_v13 = vadd.f32 %v2533_v45, %v2503_v54  ;;  %v2466_v29 = vadd.f32 %v3042_v41, %v2465_v24 }
 0x238   : > { %v2535_v51 = vadd.f32 %v2534_v13, %v2504_v6 }
 0x248   : > { %v3045_v26 = vpop.f32.mrf.mxu1 }
 0x249   : > { %2438 = vst [vmem:[%s4353_s10 + $0xf0] sm:$0xff] %v3045_v26  ;;  %v2507_v34 = vmul.f32 %v3045_v26, %v3045_v26 }
 0x24a   : > { %v2393_v14 = vpop.f32.mrf.mxu1 }
 0x24b   : > { %2436 = vst [vmem:[%s4353_s10 + $0xe0] sm:$0xff] %v2393_v14  ;;  %v2505_v39 = vmul.f32 %v2393_v14, %v2393_v14  ;;  %v2467_v1 = vadd.f32 %v2466_v29, %v2393_v14 }
 0x24c   : > { %v3046_v5 = vpop.f32.mrf.mxu1 }
 0x24d   : > { %2439 = vst [vmem:[%s4353_s10 + $0xf8] sm:$0xff] %v3046_v5  ;;  %v2536_v46 = vadd.f32 %v2535_v51, %v2505_v39  ;;  %v2508_v43 = vmul.f32 %v3046_v5, %v3046_v5 }
 0x24e   : > { %v2396_v4 = vpop.f32.mrf.mxu1 }
 0x24f   : > { %2437 = vst [vmem:[%s4353_s10 + $0xe8] sm:$0xff] %v2396_v4  ;;  %v2468_v19 = vadd.f32 %v2467_v1, %v2396_v4  ;;  %v2506_v60 = vmul.f32 %v2396_v4, %v2396_v4 }
 0x251   : > { %v2469_v11 = vadd.f32 %v3045_v26, %v2468_v19  ;;  %v2537_v27 = vadd.f32 %v2536_v46, %v2506_v60 }
 0x253   : > { %v2470_v38 = vadd.f32 %v3046_v5, %v2469_v11  ;;  %v2538_v17 = vadd.f32 %v2537_v27, %v2507_v34 }
 0x255   : > { %v2471_v16 = vrot.slane %v2470_v38, 4  ;;  %v2539_v42 = vadd.f32 %v2538_v17, %v2508_v43 }
 0x257   : > { %v2472_v50 = vadd.f32 %v2471_v16, %v2470_v38  ;;  %v2540_v37 = vrot.slane %v2539_v42, 4 }
 0x259   : > { %v2473_v32 = vrot.slane %v2472_v50, 2  ;;  %v2541_v59 = vadd.f32 %v2540_v37, %v2539_v42 }
 0x25b   : > { %v2474_v36 = vadd.f32 %v2473_v32, %v2472_v50  ;;  %v2542_v15 = vrot.slane %v2541_v59, 2 }
 0x25d   : > { %v2475_v20 = vrot.slane %v2474_v36, 1  ;;  %v2543_v47 = vadd.f32 %v2542_v15, %v2541_v59 }
 0x25f   : > { %v2544_v44 = vrot.slane %v2543_v47, 1  ;;  %v2476_v23 = vadd.f32 %v2475_v20, %v2474_v36 }
 0x261   : > { %v2545_v10 = vadd.f32 %v2544_v44, %v2543_v47 }
 0x263   : > { %v2547_v55 = vsel %vm2546_vm12, %v2476_v23, %v2545_v10 }
 0x264   : > { %2548 = vst [vmem:[%s214_s18] sm:$0x3] %v2547_v55 }
 0x265 PF: > { %s14_s14 = sadd.s32 1, %s3257_s14   ;;  %s4426_s12 = smov %s3253_s13 }
 0x266   : > { %p11_p5 = scmp.ge.s32.totalorder %s14_s14, 4   ;;  %s4427_s13 = smov %s4429_s15 }
 0x268   :  { %13 = sbr.rel (!%p11_p5) target bundleno = 2 (0x2), region = 73 }

</bundles_post_ra>
